<compile_context>
chip_gen: v5e
topology: v5e:2x2
jax: 0.10.0
libtpu: 0.0.40
codegen_flags: <defaults>
</compile_context>

<pallas_src>
import jax
import jax.numpy as jnp
from jax import lax
from jax.experimental import pallas as pl
from jax.experimental.pallas import tpu as pltpu

INPUT_SIZE = 2
HIDDEN_SIZE = 64
FC1_SIZE = 64
OUTPUT_SIZE = 1


def _peephole_lstm_kernel(
    xproj_ref,            # (T, B, 4H)  precomputed x @ W_x, seq-major
    w_h_ref,              # (H, 4H)     fused hidden->hidden weights [f,i,g,o]
    w_c_ref,              # (3, H)      peephole weights rows [ci, cf, co]
    fc1_w_ref, fc1_b_ref,  # (H, 64), (1, 64)
    fc2_w_ref, fc2_b_ref,  # (64, 1), (1, 1)
    out_ref,              # (B, OUTPUT_SIZE)
):
    T, B, _ = xproj_ref.shape
    H = HIDDEN_SIZE

    # Load weights once; hoist peephole broadcasts out of the unrolled loop.
    w_h = w_h_ref[...]
    w_c = w_c_ref[...]
    w_ci = jnp.broadcast_to(w_c[0:1, :], (B, H))
    w_cf = jnp.broadcast_to(w_c[1:2, :], (B, H))
    w_co = jnp.broadcast_to(w_c[2:3, :], (B, H))

    def step(t, carry):
        h, c = carry
        # One lane-dense (B, 4H=256) recurrent matmul per step; the input
        # projection is already folded into xproj_ref[t].
        lin = xproj_ref[t] + jnp.dot(h, w_h, preferred_element_type=jnp.float32)
        f = jax.nn.sigmoid(lin[:, 0 * H:1 * H] + c * w_cf)
        i = jax.nn.sigmoid(lin[:, 1 * H:2 * H] + c * w_ci)
        g = jnp.tanh(lin[:, 2 * H:3 * H])
        c_new = f * c + i * g
        o = jax.nn.sigmoid(lin[:, 3 * H:4 * H] + c_new * w_co)
        h_new = o * jnp.tanh(c_new)
        return h_new, c_new

    h0 = jnp.zeros((B, H), jnp.float32)
    c0 = jnp.zeros((B, H), jnp.float32)
    h, _ = lax.fori_loop(0, T, step, (h0, c0), unroll=True)

    # Tiny MLP head, runs once per call.
    z = jnp.maximum(
        jnp.dot(h, fc1_w_ref[...], preferred_element_type=jnp.float32)
        + fc1_b_ref[...], 0.0)
    out_ref[...] = (
        jnp.dot(z, fc2_w_ref[...], preferred_element_type=jnp.float32)
        + fc2_b_ref[...])


def peephole_lstm_forward(x_btd, params):
    """x_btd: (B, T, D_in) float32 -> (B, OUTPUT_SIZE) float32."""
    B, T, D_in = x_btd.shape
    H = HIDDEN_SIZE

    # Host-side weight fusion (gate order f, i, g, o matches kernel slicing).
    w_x = jnp.concatenate(
        [params["W_if"], params["W_ii"], params["W_ig"], params["W_io"]],
        axis=1)                                                    # (D_in, 4H)
    w_h = jnp.concatenate(
        [params["W_hf"], params["W_hi"], params["W_hg"], params["W_ho"]],
        axis=1)                                                    # (H, 4H)
    w_c = jnp.concatenate(
        [params["W_ci"], params["W_cf"], params["W_co"]], axis=0)  # (3, H)

    # Hoist the K=2 input projection out of the serial recurrence: one XLA
    # matmul for all T timesteps, laid out seq-major for the kernel.
    x_tbd = jnp.transpose(x_btd, (1, 0, 2))                        # (T, B, D_in)
    xproj = jnp.dot(x_tbd, w_x)                                    # (T, B, 4H)

    vmem = pl.BlockSpec(memory_space=pltpu.MemorySpace.VMEM)
    call = pl.pallas_call(
        _peephole_lstm_kernel,
        out_shape=jax.ShapeDtypeStruct((B, OUTPUT_SIZE), jnp.float32),
        in_specs=[vmem] * 7,
        out_specs=vmem,
    )
    return call(xproj, w_h, w_c,
                params["fc1_w"], params["fc1_b"],
                params["fc2_w"], params["fc2_b"])


def init_params(key):
    """Deterministic synthetic params (uniform(-1/sqrt(H), 1/sqrt(H)))."""
    H, D_in = HIDDEN_SIZE, INPUT_SIZE
    std = 1.0 / jnp.sqrt(jnp.float32(H))
    shapes = {
        "W_ci": (1, H), "W_cf": (1, H), "W_co": (1, H),
        "W_if": (D_in, H), "W_hf": (H, H),
        "W_ii": (D_in, H), "W_hi": (H, H),
        "W_ig": (D_in, H), "W_hg": (H, H),
        "W_io": (D_in, H), "W_ho": (H, H),
        "fc1_w": (H, FC1_SIZE), "fc1_b": (1, FC1_SIZE),
        "fc2_w": (FC1_SIZE, OUTPUT_SIZE), "fc2_b": (1, OUTPUT_SIZE),
    }
    params = {}
    for name, shape in sorted(shapes.items()):
        key, sub = jax.random.split(key)
        params[name] = jax.random.uniform(
            sub, shape, jnp.float32, minval=-std, maxval=std)
    return params


def ref_forward(x_btd, p):
    """Pure-JAX reference mirroring the PyTorch module exactly."""
    B, T, _ = x_btd.shape
    h = jnp.zeros((B, HIDDEN_SIZE), jnp.float32)
    c = jnp.zeros((B, HIDDEN_SIZE), jnp.float32)
    for t in range(T):
        xt = x_btd[:, t, :]
        f = jax.nn.sigmoid(xt @ p["W_if"] + h @ p["W_hf"] + c * p["W_cf"])
        i = jax.nn.sigmoid(xt @ p["W_ii"] + h @ p["W_hi"] + c * p["W_ci"])
        g = jnp.tanh(xt @ p["W_ig"] + h @ p["W_hg"])
        c = f * c + i * g
        o = jax.nn.sigmoid(xt @ p["W_io"] + h @ p["W_ho"] + c * p["W_co"])
        h = o * jnp.tanh(c)
    z = jnp.maximum(h @ p["fc1_w"] + p["fc1_b"], 0.0)
    return z @ p["fc2_w"] + p["fc2_b"]


if __name__ == "__main__":
    B, T = 8, 8    # small test shapes (batch, seq)
    key = jax.random.PRNGKey(0)
    key, xkey = jax.random.split(key)
    x = jax.random.normal(xkey, (B, T, INPUT_SIZE), jnp.float32)
    params = init_params(key)

    fwd = jax.jit(peephole_lstm_forward)
    out = fwd(x, params)
    out = jax.block_until_ready(out)

    ref = ref_forward(x, params)
    assert out.shape == (B, OUTPUT_SIZE)
    assert jnp.allclose(out, ref, atol=1e-4, rtol=1e-4), (
        f"max abs err {jnp.max(jnp.abs(out - ref))}")
    print("KERNEL_OK")
</pallas_src>

<mosaic_0001>
module attributes {stable_mosaic.version = 11 : i64} {
  func.func @_peephole_lstm_kernel(%arg0: memref<8x8x256xf32, #tpu.memory_space<vmem>>, %arg1: memref<64x256xf32, #tpu.memory_space<vmem>>, %arg2: memref<3x64xf32, #tpu.memory_space<vmem>>, %arg3: memref<64x64xf32, #tpu.memory_space<vmem>>, %arg4: memref<1x64xf32, #tpu.memory_space<vmem>>, %arg5: memref<64x1xf32, #tpu.memory_space<vmem>>, %arg6: memref<1x1xf32, #tpu.memory_space<vmem>>, %arg7: memref<8x1xf32, #tpu.memory_space<vmem>>) attributes {dimension_semantics = [], scalar_prefetch = 0 : i64, scratch_operands = 0 : i64, tpu.core_type = #tpu.core_type<tc>} {
    %c0 = arith.constant 0 : index
    %c0_0 = arith.constant 0 : index
    %0 = vector.load %arg1[%c0, %c0_0] : memref<64x256xf32, #tpu.memory_space<vmem>>, vector<64x256xf32>
    %c0_1 = arith.constant 0 : index
    %c0_2 = arith.constant 0 : index
    %1 = vector.load %arg2[%c0_1, %c0_2] : memref<3x64xf32, #tpu.memory_space<vmem>>, vector<3x64xf32>
    %2 = vector.extract_strided_slice %1 {offsets = [0, 0], sizes = [1, 64], strides = [1, 1]} : vector<3x64xf32> to vector<1x64xf32>
    %3 = vector.shape_cast %2 : vector<1x64xf32> to vector<1x64xf32>
    %4 = vector.broadcast %3 : vector<1x64xf32> to vector<8x64xf32>
    %5 = vector.extract_strided_slice %1 {offsets = [1, 0], sizes = [1, 64], strides = [1, 1]} : vector<3x64xf32> to vector<1x64xf32>
    %6 = vector.shape_cast %5 : vector<1x64xf32> to vector<1x64xf32>
    %7 = vector.broadcast %6 : vector<1x64xf32> to vector<8x64xf32>
    %8 = vector.extract_strided_slice %1 {offsets = [2, 0], sizes = [1, 64], strides = [1, 1]} : vector<3x64xf32> to vector<1x64xf32>
    %9 = vector.shape_cast %8 : vector<1x64xf32> to vector<1x64xf32>
    %10 = vector.broadcast %9 : vector<1x64xf32> to vector<8x64xf32>
    %cst = arith.constant 0.000000e+00 : f32
    %11 = vector.broadcast %cst : f32 to vector<8x64xf32>
    %cst_3 = arith.constant 0.000000e+00 : f32
    %12 = vector.broadcast %cst_3 : f32 to vector<8x64xf32>
    %c0_i32 = arith.constant 0 : i32
    %13 = arith.index_cast %c0_i32 : i32 to index
    %c0_4 = arith.constant 0 : index
    %c0_5 = arith.constant 0 : index
    %14 = vector.load %arg0[%13, %c0_4, %c0_5] : memref<8x8x256xf32, #tpu.memory_space<vmem>>, vector<1x8x256xf32>
    %15 = vector.shape_cast %14 : vector<1x8x256xf32> to vector<8x256xf32>
    %cst_6 = arith.constant dense<0.000000e+00> : vector<8x256xf32>
    %16 = tpu.matmul %11, %0, %cst_6 {dimension_numbers = #tpu.dot_dimension_numbers<[1], [0], [0], [1], [0, 0, 1, 1], [], []>} : vector<8x64xf32>, vector<64x256xf32>, vector<8x256xf32> -> vector<8x256xf32>
    %17 = arith.addf %15, %16 : vector<8x256xf32>
    %18 = vector.extract_strided_slice %17 {offsets = [0, 0], sizes = [8, 64], strides = [1, 1]} : vector<8x256xf32> to vector<8x64xf32>
    %19 = arith.mulf %12, %7 : vector<8x64xf32>
    %20 = arith.addf %18, %19 : vector<8x64xf32>
    %21 = arith.negf %20 : vector<8x64xf32>
    %22 = math.exp %21 : vector<8x64xf32>
    %cst_7 = arith.constant 1.000000e+00 : f32
    %23 = vector.broadcast %cst_7 : f32 to vector<8x64xf32>
    %24 = arith.addf %23, %22 : vector<8x64xf32>
    %25 = arith.divf %23, %24 : vector<8x64xf32>
    %26 = vector.extract_strided_slice %17 {offsets = [0, 64], sizes = [8, 64], strides = [1, 1]} : vector<8x256xf32> to vector<8x64xf32>
    %27 = arith.mulf %12, %4 : vector<8x64xf32>
    %28 = arith.addf %26, %27 : vector<8x64xf32>
    %29 = arith.negf %28 : vector<8x64xf32>
    %30 = math.exp %29 : vector<8x64xf32>
    %cst_8 = arith.constant 1.000000e+00 : f32
    %31 = vector.broadcast %cst_8 : f32 to vector<8x64xf32>
    %32 = arith.addf %31, %30 : vector<8x64xf32>
    %33 = arith.divf %31, %32 : vector<8x64xf32>
    %34 = vector.extract_strided_slice %17 {offsets = [0, 128], sizes = [8, 64], strides = [1, 1]} : vector<8x256xf32> to vector<8x64xf32>
    %35 = math.tanh %34 : vector<8x64xf32>
    %36 = arith.mulf %25, %12 : vector<8x64xf32>
    %37 = arith.mulf %33, %35 : vector<8x64xf32>
    %38 = arith.addf %36, %37 : vector<8x64xf32>
    %39 = vector.extract_strided_slice %17 {offsets = [0, 192], sizes = [8, 64], strides = [1, 1]} : vector<8x256xf32> to vector<8x64xf32>
    %40 = arith.mulf %38, %10 : vector<8x64xf32>
    %41 = arith.addf %39, %40 : vector<8x64xf32>
    %42 = arith.negf %41 : vector<8x64xf32>
    %43 = math.exp %42 : vector<8x64xf32>
    %cst_9 = arith.constant 1.000000e+00 : f32
    %44 = vector.broadcast %cst_9 : f32 to vector<8x64xf32>
    %45 = arith.addf %44, %43 : vector<8x64xf32>
    %46 = arith.divf %44, %45 : vector<8x64xf32>
    %47 = math.tanh %38 : vector<8x64xf32>
    %48 = arith.mulf %46, %47 : vector<8x64xf32>
    %c1_i32 = arith.constant 1 : i32
    %49 = arith.index_cast %c1_i32 : i32 to index
    %c0_10 = arith.constant 0 : index
    %c0_11 = arith.constant 0 : index
    %50 = vector.load %arg0[%49, %c0_10, %c0_11] : memref<8x8x256xf32, #tpu.memory_space<vmem>>, vector<1x8x256xf32>
    %51 = vector.shape_cast %50 : vector<1x8x256xf32> to vector<8x256xf32>
    %cst_12 = arith.constant dense<0.000000e+00> : vector<8x256xf32>
    %52 = tpu.matmul %48, %0, %cst_12 {dimension_numbers = #tpu.dot_dimension_numbers<[1], [0], [0], [1], [0, 0, 1, 1], [], []>} : vector<8x64xf32>, vector<64x256xf32>, vector<8x256xf32> -> vector<8x256xf32>
    %53 = arith.addf %51, %52 : vector<8x256xf32>
    %54 = vector.extract_strided_slice %53 {offsets = [0, 0], sizes = [8, 64], strides = [1, 1]} : vector<8x256xf32> to vector<8x64xf32>
    %55 = arith.mulf %38, %7 : vector<8x64xf32>
    %56 = arith.addf %54, %55 : vector<8x64xf32>
    %57 = arith.negf %56 : vector<8x64xf32>
    %58 = math.exp %57 : vector<8x64xf32>
    %cst_13 = arith.constant 1.000000e+00 : f32
    %59 = vector.broadcast %cst_13 : f32 to vector<8x64xf32>
    %60 = arith.addf %59, %58 : vector<8x64xf32>
    %61 = arith.divf %59, %60 : vector<8x64xf32>
    %62 = vector.extract_strided_slice %53 {offsets = [0, 64], sizes = [8, 64], strides = [1, 1]} : vector<8x256xf32> to vector<8x64xf32>
    %63 = arith.mulf %38, %4 : vector<8x64xf32>
    %64 = arith.addf %62, %63 : vector<8x64xf32>
    %65 = arith.negf %64 : vector<8x64xf32>
    %66 = math.exp %65 : vector<8x64xf32>
    %cst_14 = arith.constant 1.000000e+00 : f32
    %67 = vector.broadcast %cst_14 : f32 to vector<8x64xf32>
    %68 = arith.addf %67, %66 : vector<8x64xf32>
    %69 = arith.divf %67, %68 : vector<8x64xf32>
    %70 = vector.extract_strided_slice %53 {offsets = [0, 128], sizes = [8, 64], strides = [1, 1]} : vector<8x256xf32> to vector<8x64xf32>
    %71 = math.tanh %70 : vector<8x64xf32>
    %72 = arith.mulf %61, %38 : vector<8x64xf32>
    %73 = arith.mulf %69, %71 : vector<8x64xf32>
    %74 = arith.addf %72, %73 : vector<8x64xf32>
    %75 = vector.extract_strided_slice %53 {offsets = [0, 192], sizes = [8, 64], strides = [1, 1]} : vector<8x256xf32> to vector<8x64xf32>
    %76 = arith.mulf %74, %10 : vector<8x64xf32>
    %77 = arith.addf %75, %76 : vector<8x64xf32>
    %78 = arith.negf %77 : vector<8x64xf32>
    %79 = math.exp %78 : vector<8x64xf32>
    %cst_15 = arith.constant 1.000000e+00 : f32
    %80 = vector.broadcast %cst_15 : f32 to vector<8x64xf32>
    %81 = arith.addf %80, %79 : vector<8x64xf32>
    %82 = arith.divf %80, %81 : vector<8x64xf32>
    %83 = math.tanh %74 : vector<8x64xf32>
    %84 = arith.mulf %82, %83 : vector<8x64xf32>
    %c2_i32 = arith.constant 2 : i32
    %85 = arith.index_cast %c2_i32 : i32 to index
    %c0_16 = arith.constant 0 : index
    %c0_17 = arith.constant 0 : index
    %86 = vector.load %arg0[%85, %c0_16, %c0_17] : memref<8x8x256xf32, #tpu.memory_space<vmem>>, vector<1x8x256xf32>
    %87 = vector.shape_cast %86 : vector<1x8x256xf32> to vector<8x256xf32>
    %cst_18 = arith.constant dense<0.000000e+00> : vector<8x256xf32>
    %88 = tpu.matmul %84, %0, %cst_18 {dimension_numbers = #tpu.dot_dimension_numbers<[1], [0], [0], [1], [0, 0, 1, 1], [], []>} : vector<8x64xf32>, vector<64x256xf32>, vector<8x256xf32> -> vector<8x256xf32>
    %89 = arith.addf %87, %88 : vector<8x256xf32>
    %90 = vector.extract_strided_slice %89 {offsets = [0, 0], sizes = [8, 64], strides = [1, 1]} : vector<8x256xf32> to vector<8x64xf32>
    %91 = arith.mulf %74, %7 : vector<8x64xf32>
    %92 = arith.addf %90, %91 : vector<8x64xf32>
    %93 = arith.negf %92 : vector<8x64xf32>
    %94 = math.exp %93 : vector<8x64xf32>
    %cst_19 = arith.constant 1.000000e+00 : f32
    %95 = vector.broadcast %cst_19 : f32 to vector<8x64xf32>
    %96 = arith.addf %95, %94 : vector<8x64xf32>
    %97 = arith.divf %95, %96 : vector<8x64xf32>
    %98 = vector.extract_strided_slice %89 {offsets = [0, 64], sizes = [8, 64], strides = [1, 1]} : vector<8x256xf32> to vector<8x64xf32>
    %99 = arith.mulf %74, %4 : vector<8x64xf32>
    %100 = arith.addf %98, %99 : vector<8x64xf32>
    %101 = arith.negf %100 : vector<8x64xf32>
    %102 = math.exp %101 : vector<8x64xf32>
    %cst_20 = arith.constant 1.000000e+00 : f32
    %103 = vector.broadcast %cst_20 : f32 to vector<8x64xf32>
    %104 = arith.addf %103, %102 : vector<8x64xf32>
    %105 = arith.divf %103, %104 : vector<8x64xf32>
    %106 = vector.extract_strided_slice %89 {offsets = [0, 128], sizes = [8, 64], strides = [1, 1]} : vector<8x256xf32> to vector<8x64xf32>
    %107 = math.tanh %106 : vector<8x64xf32>
    %108 = arith.mulf %97, %74 : vector<8x64xf32>
    %109 = arith.mulf %105, %107 : vector<8x64xf32>
    %110 = arith.addf %108, %109 : vector<8x64xf32>
    %111 = vector.extract_strided_slice %89 {offsets = [0, 192], sizes = [8, 64], strides = [1, 1]} : vector<8x256xf32> to vector<8x64xf32>
    %112 = arith.mulf %110, %10 : vector<8x64xf32>
    %113 = arith.addf %111, %112 : vector<8x64xf32>
    %114 = arith.negf %113 : vector<8x64xf32>
    %115 = math.exp %114 : vector<8x64xf32>
    %cst_21 = arith.constant 1.000000e+00 : f32
    %116 = vector.broadcast %cst_21 : f32 to vector<8x64xf32>
    %117 = arith.addf %116, %115 : vector<8x64xf32>
    %118 = arith.divf %116, %117 : vector<8x64xf32>
    %119 = math.tanh %110 : vector<8x64xf32>
    %120 = arith.mulf %118, %119 : vector<8x64xf32>
    %c3_i32 = arith.constant 3 : i32
    %121 = arith.index_cast %c3_i32 : i32 to index
    %c0_22 = arith.constant 0 : index
    %c0_23 = arith.constant 0 : index
    %122 = vector.load %arg0[%121, %c0_22, %c0_23] : memref<8x8x256xf32, #tpu.memory_space<vmem>>, vector<1x8x256xf32>
    %123 = vector.shape_cast %122 : vector<1x8x256xf32> to vector<8x256xf32>
    %cst_24 = arith.constant dense<0.000000e+00> : vector<8x256xf32>
    %124 = tpu.matmul %120, %0, %cst_24 {dimension_numbers = #tpu.dot_dimension_numbers<[1], [0], [0], [1], [0, 0, 1, 1], [], []>} : vector<8x64xf32>, vector<64x256xf32>, vector<8x256xf32> -> vector<8x256xf32>
    %125 = arith.addf %123, %124 : vector<8x256xf32>
    %126 = vector.extract_strided_slice %125 {offsets = [0, 0], sizes = [8, 64], strides = [1, 1]} : vector<8x256xf32> to vector<8x64xf32>
    %127 = arith.mulf %110, %7 : vector<8x64xf32>
    %128 = arith.addf %126, %127 : vector<8x64xf32>
    %129 = arith.negf %128 : vector<8x64xf32>
    %130 = math.exp %129 : vector<8x64xf32>
    %cst_25 = arith.constant 1.000000e+00 : f32
    %131 = vector.broadcast %cst_25 : f32 to vector<8x64xf32>
    %132 = arith.addf %131, %130 : vector<8x64xf32>
    %133 = arith.divf %131, %132 : vector<8x64xf32>
    %134 = vector.extract_strided_slice %125 {offsets = [0, 64], sizes = [8, 64], strides = [1, 1]} : vector<8x256xf32> to vector<8x64xf32>
    %135 = arith.mulf %110, %4 : vector<8x64xf32>
    %136 = arith.addf %134, %135 : vector<8x64xf32>
    %137 = arith.negf %136 : vector<8x64xf32>
    %138 = math.exp %137 : vector<8x64xf32>
    %cst_26 = arith.constant 1.000000e+00 : f32
    %139 = vector.broadcast %cst_26 : f32 to vector<8x64xf32>
    %140 = arith.addf %139, %138 : vector<8x64xf32>
    %141 = arith.divf %139, %140 : vector<8x64xf32>
    %142 = vector.extract_strided_slice %125 {offsets = [0, 128], sizes = [8, 64], strides = [1, 1]} : vector<8x256xf32> to vector<8x64xf32>
    %143 = math.tanh %142 : vector<8x64xf32>
    %144 = arith.mulf %133, %110 : vector<8x64xf32>
    %145 = arith.mulf %141, %143 : vector<8x64xf32>
    %146 = arith.addf %144, %145 : vector<8x64xf32>
    %147 = vector.extract_strided_slice %125 {offsets = [0, 192], sizes = [8, 64], strides = [1, 1]} : vector<8x256xf32> to vector<8x64xf32>
    %148 = arith.mulf %146, %10 : vector<8x64xf32>
    %149 = arith.addf %147, %148 : vector<8x64xf32>
    %150 = arith.negf %149 : vector<8x64xf32>
    %151 = math.exp %150 : vector<8x64xf32>
    %cst_27 = arith.constant 1.000000e+00 : f32
    %152 = vector.broadcast %cst_27 : f32 to vector<8x64xf32>
    %153 = arith.addf %152, %151 : vector<8x64xf32>
    %154 = arith.divf %152, %153 : vector<8x64xf32>
    %155 = math.tanh %146 : vector<8x64xf32>
    %156 = arith.mulf %154, %155 : vector<8x64xf32>
    %c4_i32 = arith.constant 4 : i32
    %157 = arith.index_cast %c4_i32 : i32 to index
    %c0_28 = arith.constant 0 : index
    %c0_29 = arith.constant 0 : index
    %158 = vector.load %arg0[%157, %c0_28, %c0_29] : memref<8x8x256xf32, #tpu.memory_space<vmem>>, vector<1x8x256xf32>
    %159 = vector.shape_cast %158 : vector<1x8x256xf32> to vector<8x256xf32>
    %cst_30 = arith.constant dense<0.000000e+00> : vector<8x256xf32>
    %160 = tpu.matmul %156, %0, %cst_30 {dimension_numbers = #tpu.dot_dimension_numbers<[1], [0], [0], [1], [0, 0, 1, 1], [], []>} : vector<8x64xf32>, vector<64x256xf32>, vector<8x256xf32> -> vector<8x256xf32>
    %161 = arith.addf %159, %160 : vector<8x256xf32>
    %162 = vector.extract_strided_slice %161 {offsets = [0, 0], sizes = [8, 64], strides = [1, 1]} : vector<8x256xf32> to vector<8x64xf32>
    %163 = arith.mulf %146, %7 : vector<8x64xf32>
    %164 = arith.addf %162, %163 : vector<8x64xf32>
    %165 = arith.negf %164 : vector<8x64xf32>
    %166 = math.exp %165 : vector<8x64xf32>
    %cst_31 = arith.constant 1.000000e+00 : f32
    %167 = vector.broadcast %cst_31 : f32 to vector<8x64xf32>
    %168 = arith.addf %167, %166 : vector<8x64xf32>
    %169 = arith.divf %167, %168 : vector<8x64xf32>
    %170 = vector.extract_strided_slice %161 {offsets = [0, 64], sizes = [8, 64], strides = [1, 1]} : vector<8x256xf32> to vector<8x64xf32>
    %171 = arith.mulf %146, %4 : vector<8x64xf32>
    %172 = arith.addf %170, %171 : vector<8x64xf32>
    %173 = arith.negf %172 : vector<8x64xf32>
    %174 = math.exp %173 : vector<8x64xf32>
    %cst_32 = arith.constant 1.000000e+00 : f32
    %175 = vector.broadcast %cst_32 : f32 to vector<8x64xf32>
    %176 = arith.addf %175, %174 : vector<8x64xf32>
    %177 = arith.divf %175, %176 : vector<8x64xf32>
    %178 = vector.extract_strided_slice %161 {offsets = [0, 128], sizes = [8, 64], strides = [1, 1]} : vector<8x256xf32> to vector<8x64xf32>
    %179 = math.tanh %178 : vector<8x64xf32>
    %180 = arith.mulf %169, %146 : vector<8x64xf32>
    %181 = arith.mulf %177, %179 : vector<8x64xf32>
    %182 = arith.addf %180, %181 : vector<8x64xf32>
    %183 = vector.extract_strided_slice %161 {offsets = [0, 192], sizes = [8, 64], strides = [1, 1]} : vector<8x256xf32> to vector<8x64xf32>
    %184 = arith.mulf %182, %10 : vector<8x64xf32>
    %185 = arith.addf %183, %184 : vector<8x64xf32>
    %186 = arith.negf %185 : vector<8x64xf32>
    %187 = math.exp %186 : vector<8x64xf32>
    %cst_33 = arith.constant 1.000000e+00 : f32
    %188 = vector.broadcast %cst_33 : f32 to vector<8x64xf32>
    %189 = arith.addf %188, %187 : vector<8x64xf32>
    %190 = arith.divf %188, %189 : vector<8x64xf32>
    %191 = math.tanh %182 : vector<8x64xf32>
    %192 = arith.mulf %190, %191 : vector<8x64xf32>
    %c5_i32 = arith.constant 5 : i32
    %193 = arith.index_cast %c5_i32 : i32 to index
    %c0_34 = arith.constant 0 : index
    %c0_35 = arith.constant 0 : index
    %194 = vector.load %arg0[%193, %c0_34, %c0_35] : memref<8x8x256xf32, #tpu.memory_space<vmem>>, vector<1x8x256xf32>
    %195 = vector.shape_cast %194 : vector<1x8x256xf32> to vector<8x256xf32>
    %cst_36 = arith.constant dense<0.000000e+00> : vector<8x256xf32>
    %196 = tpu.matmul %192, %0, %cst_36 {dimension_numbers = #tpu.dot_dimension_numbers<[1], [0], [0], [1], [0, 0, 1, 1], [], []>} : vector<8x64xf32>, vector<64x256xf32>, vector<8x256xf32> -> vector<8x256xf32>
    %197 = arith.addf %195, %196 : vector<8x256xf32>
    %198 = vector.extract_strided_slice %197 {offsets = [0, 0], sizes = [8, 64], strides = [1, 1]} : vector<8x256xf32> to vector<8x64xf32>
    %199 = arith.mulf %182, %7 : vector<8x64xf32>
    %200 = arith.addf %198, %199 : vector<8x64xf32>
    %201 = arith.negf %200 : vector<8x64xf32>
    %202 = math.exp %201 : vector<8x64xf32>
    %cst_37 = arith.constant 1.000000e+00 : f32
    %203 = vector.broadcast %cst_37 : f32 to vector<8x64xf32>
    %204 = arith.addf %203, %202 : vector<8x64xf32>
    %205 = arith.divf %203, %204 : vector<8x64xf32>
    %206 = vector.extract_strided_slice %197 {offsets = [0, 64], sizes = [8, 64], strides = [1, 1]} : vector<8x256xf32> to vector<8x64xf32>
    %207 = arith.mulf %182, %4 : vector<8x64xf32>
    %208 = arith.addf %206, %207 : vector<8x64xf32>
    %209 = arith.negf %208 : vector<8x64xf32>
    %210 = math.exp %209 : vector<8x64xf32>
    %cst_38 = arith.constant 1.000000e+00 : f32
    %211 = vector.broadcast %cst_38 : f32 to vector<8x64xf32>
    %212 = arith.addf %211, %210 : vector<8x64xf32>
    %213 = arith.divf %211, %212 : vector<8x64xf32>
    %214 = vector.extract_strided_slice %197 {offsets = [0, 128], sizes = [8, 64], strides = [1, 1]} : vector<8x256xf32> to vector<8x64xf32>
    %215 = math.tanh %214 : vector<8x64xf32>
    %216 = arith.mulf %205, %182 : vector<8x64xf32>
    %217 = arith.mulf %213, %215 : vector<8x64xf32>
    %218 = arith.addf %216, %217 : vector<8x64xf32>
    %219 = vector.extract_strided_slice %197 {offsets = [0, 192], sizes = [8, 64], strides = [1, 1]} : vector<8x256xf32> to vector<8x64xf32>
    %220 = arith.mulf %218, %10 : vector<8x64xf32>
    %221 = arith.addf %219, %220 : vector<8x64xf32>
    %222 = arith.negf %221 : vector<8x64xf32>
    %223 = math.exp %222 : vector<8x64xf32>
    %cst_39 = arith.constant 1.000000e+00 : f32
    %224 = vector.broadcast %cst_39 : f32 to vector<8x64xf32>
    %225 = arith.addf %224, %223 : vector<8x64xf32>
    %226 = arith.divf %224, %225 : vector<8x64xf32>
    %227 = math.tanh %218 : vector<8x64xf32>
    %228 = arith.mulf %226, %227 : vector<8x64xf32>
    %c6_i32 = arith.constant 6 : i32
    %229 = arith.index_cast %c6_i32 : i32 to index
    %c0_40 = arith.constant 0 : index
    %c0_41 = arith.constant 0 : index
    %230 = vector.load %arg0[%229, %c0_40, %c0_41] : memref<8x8x256xf32, #tpu.memory_space<vmem>>, vector<1x8x256xf32>
    %231 = vector.shape_cast %230 : vector<1x8x256xf32> to vector<8x256xf32>
    %cst_42 = arith.constant dense<0.000000e+00> : vector<8x256xf32>
    %232 = tpu.matmul %228, %0, %cst_42 {dimension_numbers = #tpu.dot_dimension_numbers<[1], [0], [0], [1], [0, 0, 1, 1], [], []>} : vector<8x64xf32>, vector<64x256xf32>, vector<8x256xf32> -> vector<8x256xf32>
    %233 = arith.addf %231, %232 : vector<8x256xf32>
    %234 = vector.extract_strided_slice %233 {offsets = [0, 0], sizes = [8, 64], strides = [1, 1]} : vector<8x256xf32> to vector<8x64xf32>
    %235 = arith.mulf %218, %7 : vector<8x64xf32>
    %236 = arith.addf %234, %235 : vector<8x64xf32>
    %237 = arith.negf %236 : vector<8x64xf32>
    %238 = math.exp %237 : vector<8x64xf32>
    %cst_43 = arith.constant 1.000000e+00 : f32
    %239 = vector.broadcast %cst_43 : f32 to vector<8x64xf32>
    %240 = arith.addf %239, %238 : vector<8x64xf32>
    %241 = arith.divf %239, %240 : vector<8x64xf32>
    %242 = vector.extract_strided_slice %233 {offsets = [0, 64], sizes = [8, 64], strides = [1, 1]} : vector<8x256xf32> to vector<8x64xf32>
    %243 = arith.mulf %218, %4 : vector<8x64xf32>
    %244 = arith.addf %242, %243 : vector<8x64xf32>
    %245 = arith.negf %244 : vector<8x64xf32>
    %246 = math.exp %245 : vector<8x64xf32>
    %cst_44 = arith.constant 1.000000e+00 : f32
    %247 = vector.broadcast %cst_44 : f32 to vector<8x64xf32>
    %248 = arith.addf %247, %246 : vector<8x64xf32>
    %249 = arith.divf %247, %248 : vector<8x64xf32>
    %250 = vector.extract_strided_slice %233 {offsets = [0, 128], sizes = [8, 64], strides = [1, 1]} : vector<8x256xf32> to vector<8x64xf32>
    %251 = math.tanh %250 : vector<8x64xf32>
    %252 = arith.mulf %241, %218 : vector<8x64xf32>
    %253 = arith.mulf %249, %251 : vector<8x64xf32>
    %254 = arith.addf %252, %253 : vector<8x64xf32>
    %255 = vector.extract_strided_slice %233 {offsets = [0, 192], sizes = [8, 64], strides = [1, 1]} : vector<8x256xf32> to vector<8x64xf32>
    %256 = arith.mulf %254, %10 : vector<8x64xf32>
    %257 = arith.addf %255, %256 : vector<8x64xf32>
    %258 = arith.negf %257 : vector<8x64xf32>
    %259 = math.exp %258 : vector<8x64xf32>
    %cst_45 = arith.constant 1.000000e+00 : f32
    %260 = vector.broadcast %cst_45 : f32 to vector<8x64xf32>
    %261 = arith.addf %260, %259 : vector<8x64xf32>
    %262 = arith.divf %260, %261 : vector<8x64xf32>
    %263 = math.tanh %254 : vector<8x64xf32>
    %264 = arith.mulf %262, %263 : vector<8x64xf32>
    %c7_i32 = arith.constant 7 : i32
    %265 = arith.index_cast %c7_i32 : i32 to index
    %c0_46 = arith.constant 0 : index
    %c0_47 = arith.constant 0 : index
    %266 = vector.load %arg0[%265, %c0_46, %c0_47] : memref<8x8x256xf32, #tpu.memory_space<vmem>>, vector<1x8x256xf32>
    %267 = vector.shape_cast %266 : vector<1x8x256xf32> to vector<8x256xf32>
    %cst_48 = arith.constant dense<0.000000e+00> : vector<8x256xf32>
    %268 = tpu.matmul %264, %0, %cst_48 {dimension_numbers = #tpu.dot_dimension_numbers<[1], [0], [0], [1], [0, 0, 1, 1], [], []>} : vector<8x64xf32>, vector<64x256xf32>, vector<8x256xf32> -> vector<8x256xf32>
    %269 = arith.addf %267, %268 : vector<8x256xf32>
    %270 = vector.extract_strided_slice %269 {offsets = [0, 0], sizes = [8, 64], strides = [1, 1]} : vector<8x256xf32> to vector<8x64xf32>
    %271 = arith.mulf %254, %7 : vector<8x64xf32>
    %272 = arith.addf %270, %271 : vector<8x64xf32>
    %273 = arith.negf %272 : vector<8x64xf32>
    %274 = math.exp %273 : vector<8x64xf32>
    %cst_49 = arith.constant 1.000000e+00 : f32
    %275 = vector.broadcast %cst_49 : f32 to vector<8x64xf32>
    %276 = arith.addf %275, %274 : vector<8x64xf32>
    %277 = arith.divf %275, %276 : vector<8x64xf32>
    %278 = vector.extract_strided_slice %269 {offsets = [0, 64], sizes = [8, 64], strides = [1, 1]} : vector<8x256xf32> to vector<8x64xf32>
    %279 = arith.mulf %254, %4 : vector<8x64xf32>
    %280 = arith.addf %278, %279 : vector<8x64xf32>
    %281 = arith.negf %280 : vector<8x64xf32>
    %282 = math.exp %281 : vector<8x64xf32>
    %cst_50 = arith.constant 1.000000e+00 : f32
    %283 = vector.broadcast %cst_50 : f32 to vector<8x64xf32>
    %284 = arith.addf %283, %282 : vector<8x64xf32>
    %285 = arith.divf %283, %284 : vector<8x64xf32>
    %286 = vector.extract_strided_slice %269 {offsets = [0, 128], sizes = [8, 64], strides = [1, 1]} : vector<8x256xf32> to vector<8x64xf32>
    %287 = math.tanh %286 : vector<8x64xf32>
    %288 = arith.mulf %277, %254 : vector<8x64xf32>
    %289 = arith.mulf %285, %287 : vector<8x64xf32>
    %290 = arith.addf %288, %289 : vector<8x64xf32>
    %291 = vector.extract_strided_slice %269 {offsets = [0, 192], sizes = [8, 64], strides = [1, 1]} : vector<8x256xf32> to vector<8x64xf32>
    %292 = arith.mulf %290, %10 : vector<8x64xf32>
    %293 = arith.addf %291, %292 : vector<8x64xf32>
    %294 = arith.negf %293 : vector<8x64xf32>
    %295 = math.exp %294 : vector<8x64xf32>
    %cst_51 = arith.constant 1.000000e+00 : f32
    %296 = vector.broadcast %cst_51 : f32 to vector<8x64xf32>
    %297 = arith.addf %296, %295 : vector<8x64xf32>
    %298 = arith.divf %296, %297 : vector<8x64xf32>
    %299 = math.tanh %290 : vector<8x64xf32>
    %300 = arith.mulf %298, %299 : vector<8x64xf32>
    %c8_i32 = arith.constant 8 : i32
    %c0_52 = arith.constant 0 : index
    %c0_53 = arith.constant 0 : index
    %301 = vector.load %arg3[%c0_52, %c0_53] : memref<64x64xf32, #tpu.memory_space<vmem>>, vector<64x64xf32>
    %cst_54 = arith.constant dense<0.000000e+00> : vector<8x64xf32>
    %302 = tpu.matmul %300, %301, %cst_54 {dimension_numbers = #tpu.dot_dimension_numbers<[1], [0], [0], [1], [0, 0, 1, 1], [], []>} : vector<8x64xf32>, vector<64x64xf32>, vector<8x64xf32> -> vector<8x64xf32>
    %c0_55 = arith.constant 0 : index
    %c0_56 = arith.constant 0 : index
    %303 = vector.load %arg4[%c0_55, %c0_56] : memref<1x64xf32, #tpu.memory_space<vmem>>, vector<1x64xf32>
    %304 = vector.broadcast %303 : vector<1x64xf32> to vector<8x64xf32>
    %305 = arith.addf %302, %304 : vector<8x64xf32>
    %cst_57 = arith.constant 0.000000e+00 : f32
    %306 = vector.broadcast %cst_57 : f32 to vector<8x64xf32>
    %307 = arith.maximumf %305, %306 : vector<8x64xf32>
    %c0_58 = arith.constant 0 : index
    %c0_59 = arith.constant 0 : index
    %308 = vector.load %arg5[%c0_58, %c0_59] : memref<64x1xf32, #tpu.memory_space<vmem>>, vector<64x1xf32>
    %cst_60 = arith.constant dense<0.000000e+00> : vector<8x1xf32>
    %309 = tpu.matmul %307, %308, %cst_60 {dimension_numbers = #tpu.dot_dimension_numbers<[1], [0], [0], [1], [0, 0, 1, 1], [], []>} : vector<8x64xf32>, vector<64x1xf32>, vector<8x1xf32> -> vector<8x1xf32>
    %c0_61 = arith.constant 0 : index
    %c0_62 = arith.constant 0 : index
    %310 = vector.load %arg6[%c0_61, %c0_62] : memref<1x1xf32, #tpu.memory_space<vmem>>, vector<1x1xf32>
    %311 = vector.broadcast %310 : vector<1x1xf32> to vector<8x1xf32>
    %312 = arith.addf %309, %311 : vector<8x1xf32>
    %c0_63 = arith.constant 0 : index
    %c0_64 = arith.constant 0 : index
    %313 = vector.load %arg7[%c0_63, %c0_64] : memref<8x1xf32, #tpu.memory_space<vmem>>, vector<8x1xf32>
    tpu.vector_store %arg7[%c0_63, %c0_64], %312 {strides = array<i32>} : memref<8x1xf32, #tpu.memory_space<vmem>>, vector<8x1xf32>,
    return
  }
}

</mosaic_0001>

<bundles_post_ra>
// kernel: peephole_lstm_forward.1
= control target key start
LH: loop header
LB: loop body
LE: loop exit
PB: predicated region body
PF: predicated region fallthrough
CT: control target
= control target key end

     0   :  { %s1423_s28 = smov 64   ;;  %v1424_v19 = vmov 0.0   ;;  %vm50_vm12 = vcmask 523264   ;;  %s1961_s1 = inlined_call_operand.vmem [shape: f32[64,256], index: 1, kind: input, shape index: {}]   ;;  %s1962_s2 = inlined_call_operand.vmem [shape: f32[3,64], index: 2, kind: input, shape index: {}]   ;;  %s1963_s0 = inlined_call_operand.vmem [shape: f32[8,8,256], index: 0, kind: input, shape index: {}]   ;;  %s1964_s4 = inlined_call_operand.vmem [shape: f32[1,64], index: 4, kind: input, shape index: {}]   ;;  %s1965_s3 = inlined_call_operand.vmem [shape: f32[64,64], index: 3, kind: input, shape index: {}]   ;;  %s1966_s5 = inlined_call_operand.vmem [shape: f32[64,1], index: 5, kind: input, shape index: {}]   ;;  %s1967_s6 = inlined_call_operand.<no memory space> [shape: f32[1,1], index: 6, kind: input, shape index: {}]   ;;  %s1968_s7 = inlined_call_operand.vmem [shape: f32[8,1], index: 7, kind: output, shape index: {}]  }
   0x1   :  { %v1468_v0 = vld [vmem:[%s1961_s1 + $0x78] sm:$0xff]  ;;  %v1473_v1 = vld [vmem:[%s1961_s1 + $0x68] sm:$0xff]  ;;  %v1485_v3 = vld [vmem:[%s1961_s1 + $0x70] sm:$0xff] }
   0x2   :  { %82 = vmatpush.msra.mxu1 %v1468_v0  ;;  %221 = vmatpush.msra.mxu3 %v1468_v0  ;;  %v1480_v2 = vld [vmem:[%s1961_s1 + $0x58] sm:$0xff]  ;;  %v1492_v4 = vld [vmem:[%s1961_s1 + $0x60] sm:$0xff]  ;;  %v1497_v5 = vld [vmem:[%s1961_s1 + $0x48] sm:$0xff] }
   0x3   :  { %62 = vmatpush.msra.mxu0 %v1485_v3  ;;  %v1502_v6 = vld [vmem:[%s1961_s1 + $0x50] sm:$0xff]  ;;  %201 = vmatpush.msra.mxu2 %v1485_v3  ;;  %v1511_v7 = vld [vmem:[%s1962_s2] sm:$0x7]  ;;  %v1516_v8 = vld [vmem:[%s1961_s1 + $0x38] sm:$0xff] }
   0x4   :  { %83 = vmatpush.msra.mxu1 %v1473_v1  ;;  %222 = vmatpush.msra.mxu3 %v1473_v1  ;;  %v1521_v9 = vld [vmem:[%s1961_s1 + $0x40] sm:$0xff]  ;;  %v1524_v10 = vperm.slane %v1511_v7, 0  ;;  %v1533_v11 = vld [vmem:[%s1961_s1 + $0x28] sm:$0xff]  ;;  %v1538_v12 = vld [vmem:[%s1961_s1 + $0x30] sm:$0xff]  ;;  %v1647_v44 = vperm.slane %v1511_v7, 1  ;;  %v1651_v61 = vperm.slane %v1511_v7, 2 }
   0x5   :  { %63 = vmatpush.msra.mxu0 %v1492_v4  ;;  %202 = vmatpush.msra.mxu2 %v1492_v4  ;;  %v1548_v14 = vld [vmem:[%s1961_s1 + $0x18] sm:$0xff]  ;;  %v1553_v15 = vld [vmem:[%s1961_s1 + $0x20] sm:$0xff]  ;;  %v1562_v16 = vld [vmem:[%s1961_s1 + $0x8] sm:$0xff] }
   0x6   :  { %84 = vmatpush.msra.mxu1 %v1480_v2  ;;  %223 = vmatpush.msra.mxu3 %v1480_v2  ;;  %v117_v13 = vmul.f32 0.0, %v1524_v10  ;;  %v1567_v17 = vld [vmem:[%s1961_s1 + $0x10] sm:$0xff]  ;;  %v1576_v18 = vld [vmem:[%s1961_s1] sm:$0xff]  ;;  %v49_v20 = vld [vmem:[%s1963_s0 + $0x8] sm:$0xff]  ;;  %v96_v45 = vmul.f32 0.0, %v1647_v44 }
   0x7   :  { %64 = vmatpush.msra.mxu0 %v1502_v6  ;;  %203 = vmatpush.msra.mxu2 %v1502_v6  ;;  %v48_v24 = vld [vmem:[%s1963_s0] sm:$0xff] }
   0x8   :  { %85 = vmatpush.msra.mxu1 %v1497_v5  ;;  %224 = vmatpush.msra.mxu3 %v1497_v5 }
   0x9   :  { %65 = vmatpush.msra.mxu0 %v1521_v9  ;;  %119 = vrot.lane.b32.xlu0 %v117_v13, %s1423_s28 }
   0xa   :  { %86 = vmatpush.msra.mxu1 %v1516_v8  ;;  %204 = vmatpush.msra.mxu2 %v1521_v9 }
   0xb   :  { %66 = vmatpush.msra.mxu0 %v1538_v12  ;;  %225 = vmatpush.msra.mxu3 %v1516_v8 }
   0xc   :  { %87 = vmatpush.msra.mxu1 %v1533_v11  ;;  %205 = vmatpush.msra.mxu2 %v1538_v12 }
   0xd   :  { %67 = vmatpush.msra.mxu0 %v1553_v15  ;;  %226 = vmatpush.msra.mxu3 %v1533_v11 }
   0xe   :  { %88 = vmatpush.msra.mxu1 %v1548_v14  ;;  %206 = vmatpush.msra.mxu2 %v1553_v15 }
   0xf   :  { %68 = vmatpush.msra.mxu0 %v1567_v17  ;;  %227 = vmatpush.msra.mxu3 %v1548_v14 }
  0x10   :  { %89 = vmatpush.msra.mxu1 %v1562_v16  ;;  %207 = vmatpush.msra.mxu2 %v1567_v17 }
  0x11   :  { %90 = vmatmul.f32.vlgmr.msra.gmra.mxu1 %v1424_v19  ;;  %69 = vmatpush.msra.mxu0 %v1576_v18 }
  0x12   :  { %70 = vmatmul.f32.vlgmr.msra.gmra.mxu0 %v1424_v19  ;;  %208 = vmatpush.msra.mxu2 %v1576_v18 }
  0x13   :  { %228 = vmatpush.msra.mxu3 %v1562_v16  ;;  %340 = vmatpush.msrb.mxu0 %v1485_v3 }
  0x14   :  { %360 = vmatpush.msrb.mxu1 %v1468_v0  ;;  %479 = vmatpush.msrb.mxu2 %v1485_v3 }
  0x15   :  { %341 = vmatpush.msrb.mxu0 %v1492_v4  ;;  %499 = vmatpush.msrb.mxu3 %v1468_v0 }
  0x16   :  { %361 = vmatpush.msrb.mxu1 %v1473_v1  ;;  %480 = vmatpush.msrb.mxu2 %v1492_v4 }
  0x17   :  { %342 = vmatpush.msrb.mxu0 %v1502_v6  ;;  %500 = vmatpush.msrb.mxu3 %v1473_v1 }
  0x18   :  { %362 = vmatpush.msrb.mxu1 %v1480_v2  ;;  %481 = vmatpush.msrb.mxu2 %v1502_v6 }
  0x19   :  { %343 = vmatpush.msrb.mxu0 %v1521_v9  ;;  %501 = vmatpush.msrb.mxu3 %v1480_v2 }
  0x1a   :  { %363 = vmatpush.msrb.mxu1 %v1497_v5  ;;  %482 = vmatpush.msrb.mxu2 %v1521_v9 }
  0x1b   :  { %344 = vmatpush.msrb.mxu0 %v1538_v12  ;;  %502 = vmatpush.msrb.mxu3 %v1497_v5 }
  0x1c   :  { %364 = vmatpush.msrb.mxu1 %v1516_v8  ;;  %483 = vmatpush.msrb.mxu2 %v1538_v12 }
  0x1d   :  { %345 = vmatpush.msrb.mxu0 %v1553_v15  ;;  %503 = vmatpush.msrb.mxu3 %v1516_v8 }
  0x1e   :  { %365 = vmatpush.msrb.mxu1 %v1533_v11  ;;  %484 = vmatpush.msrb.mxu2 %v1553_v15 }
  0x1f   :  { %346 = vmatpush.msrb.mxu0 %v1567_v17  ;;  %504 = vmatpush.msrb.mxu3 %v1533_v11 }
  0x20   :  { %366 = vmatpush.msrb.mxu1 %v1548_v14  ;;  %485 = vmatpush.msrb.mxu2 %v1567_v17 }
  0x21   :  { %347 = vmatpush.msrb.mxu0 %v1576_v18  ;;  %505 = vmatpush.msrb.mxu3 %v1548_v14 }
  0x22   :  { %367 = vmatpush.msrb.mxu1 %v1562_v16  ;;  %486 = vmatpush.msrb.mxu2 %v1576_v18 }
  0x23   :  { %506 = vmatpush.msrb.mxu3 %v1562_v16  ;;  %618 = vmatpush.msra.mxu0 %v1485_v3 }
  0x24   :  { %638 = vmatpush.msra.mxu1 %v1468_v0 }
  0x25   :  { %619 = vmatpush.msra.mxu0 %v1492_v4 }
  0x26   :  { %639 = vmatpush.msra.mxu1 %v1473_v1 }
  0x27   :  { %620 = vmatpush.msra.mxu0 %v1502_v6 }
  0x28   :  { %640 = vmatpush.msra.mxu1 %v1480_v2 }
  0x29   :  { %621 = vmatpush.msra.mxu0 %v1521_v9 }
  0x2a   :  { %641 = vmatpush.msra.mxu1 %v1497_v5 }
  0x2b   :  { %622 = vmatpush.msra.mxu0 %v1538_v12 }
  0x2c   :  { %642 = vmatpush.msra.mxu1 %v1516_v8 }
  0x2d   :  { %623 = vmatpush.msra.mxu0 %v1553_v15 }
  0x2e   :  { %643 = vmatpush.msra.mxu1 %v1533_v11 }
  0x2f   :  { %624 = vmatpush.msra.mxu0 %v1567_v17 }
  0x30   :  { %644 = vmatpush.msra.mxu1 %v1548_v14 }
  0x31   :  { %625 = vmatpush.msra.mxu0 %v1576_v18 }
  0x32   :  { %645 = vmatpush.msra.mxu1 %v1562_v16 }
  0x7b   :  { %v120_v27 = vpop.permute.xlu0 %119 }
  0x8e   :  { %v91_v21 = vpop.f32.mrf.mxu1 }
  0x8f   :  { %v1638_v22 = vadd.f32 %v91_v21, %v49_v20  ;;  %v71_v25 = vpop.f32.mrf.mxu0 }
  0x90   :  { %v94_v26 = vadd.f32 %v71_v25, %v48_v24 }
  0x91   :  { %1295 = vtanh.f32 %v1638_v22 }
  0x92   :  { %v122_v28 = vadd.f32 %v120_v27, %v94_v26  ;;  %v97_v46 = vadd.f32 %v96_v45, %v94_v26 }
  0x94   :  { %v1238_v29 = vmul.f32 -1.442695, %v122_v28  ;;  %v1237_v47 = vmul.f32 -1.442695, %v97_v46 }
  0x96   :  { %1297 = vpow2.f32 %v1238_v29 }
  0x97   :  { %v1296_v23 = vpop.eup %1295 }
  0x98   :  { %145 = vrot.lane.b32.xlu0 %v1296_v23, %s1423_s28 }
  0x9c   :  { %v1298_v30 = vpop.eup %1297 }
  0x9d   :  { %v126_v31 = vadd.f32 1.0, %v1298_v30 }
  0x9f   :  { %1299 = vrcp.f32 %v126_v31  ;;  %vm132_vm0 = vweird.f32 %v126_v31  ;;  %v138_v36 = vand.u32 2147483648, %v126_v31  ;;  %v136_v38 = vand.u32 2147483647, %v126_v31 }
  0xa0   :  { %1301 = vpow2.f32 %v1237_v47 }
  0xa1   :  { %v139_v39 = vor.u32 1.1754944e-38, %v138_v36  ;;  %vm137_vm3 = vcmp.eq.f32.partialorder %v136_v38, 8.507059e+37  ;;  %v1241_v38 = vld [vmem:[%s1963_s0 + $0x18] sm:$0xff] }
  0xa5   :  { %v1300_v32 = vpop.eup %1299 }
  0xa6   :  { %v128_v33 = vmul.f32 %v1300_v32, %v126_v31  ;;  %vm133_vm1 = vweird.f32 %v1300_v32  ;;  %v1302_v48 = vpop.eup %1301 }
  0xa7   :  { %vm134_vm2 = vmor %vm132_vm0, %vm133_vm1  ;;  %v101_v49 = vadd.f32 1.0, %v1302_v48 }
  0xa8   :  { %v129_v34 = vsub.f32 1.0, %v128_v33 }
  0xa9   :  { %1303 = vrcp.f32 %v101_v49  ;;  %vm107_vm4 = vweird.f32 %v101_v49  ;;  %v113_v54 = vand.u32 2147483648, %v101_v49  ;;  %v111_v56 = vand.u32 2147483647, %v101_v49 }
  0xaa   :  { %v130_v35 = vmul.f32 %v1300_v32, %v129_v34 }
  0xab   :  { %v114_v57 = vor.u32 1.1754944e-38, %v113_v54  ;;  %vm112_vm7 = vcmp.eq.f32.partialorder %v111_v56, 8.507059e+37 }
  0xac   :  { %v131_v37 = vadd.f32 %v1300_v32, %v130_v35 }
  0xae   :  { %v135_v40 = vsel %vm134_vm2, %v1300_v32, %v131_v37 }
  0xaf   :  { %v140_v42 = vsel %vm137_vm3, %v139_v39, %v135_v40  ;;  %v1304_v50 = vpop.eup %1303 }
  0xb0   :  { %v103_v51 = vmul.f32 %v1304_v50, %v101_v49  ;;  %vm108_vm5 = vweird.f32 %v1304_v50 }
  0xb1   :  { %vm109_vm6 = vmor %vm107_vm4, %vm108_vm5 }
  0xb2   :  { %v104_v52 = vsub.f32 1.0, %v103_v51 }
  0xb4   :  { %v105_v53 = vmul.f32 %v1304_v50, %v104_v52 }
  0xb6   :  { %v106_v55 = vadd.f32 %v1304_v50, %v105_v53 }
  0xb8   :  { %v110_v58 = vsel %vm109_vm6, %v1304_v50, %v106_v55 }
  0xb9   :  { %v115_v59 = vsel %vm112_vm7, %v114_v57, %v110_v58 }
  0xba   :  { %v143_v60 = vmul.f32 0.0, %v115_v59 }
 0x10a   :  { %v146_v41 = vpop.permute.xlu0 %145 }
 0x10b   :  { %v148_v43 = vmul.f32 %v146_v41, %v140_v42  ;;  %v1240_v42 = vld [vmem:[%s1963_s0 + $0x10] sm:$0xff] }
 0x10d   :  { %150 = vrot.lane.b32.xlu1 %v148_v43, %s1423_s28 }
 0x17f   :  { %v151_v62 = vpop.permute.xlu1 %150 }
 0x180   :  { %v1653_v63 = vadd.f32 %v151_v62, %v143_v60 }
 0x182   :  { %v256_v13 = vmul.f32 %v1653_v63, %v1524_v10  ;;  %v154_v19 = vmul.f32 %v1653_v63, %v1651_v61  ;;  %1305 = vtanh.f32 %v1653_v63 }
 0x184   :  { %258 = vrot.lane.b32.xlu0 %v256_v13, %s1423_s28  ;;  %156 = vrot.lane.b32.xlu1 %v154_v19, %s1423_s28  ;;  %v235_v19 = vmul.f32 %v1653_v63, %v1647_v44 }
 0x188   :  { %v1306_v20 = vpop.eup %1305 }
 0x189   :  { %181 = vrot.lane.b32.xlu2 %v1306_v20, %s1423_s28 }
 0x1e3   :  { %v182_v35 = vpop.permute.xlu2 %181 }
 0x1f6   :  { %v157_v7 = vpop.permute.xlu1 %156  ;;  %v259_v46 = vpop.permute.xlu0 %258 }
 0x1f7   :  { %v159_v21 = vadd.f32 %v157_v7, %v1638_v22 }
 0x1f9   :  { %v1239_v23 = vmul.f32 -1.442695, %v159_v21 }
 0x1fb   :  { %1307 = vpow2.f32 %v1239_v23 }
 0x201   :  { %v1308_v24 = vpop.eup %1307 }
 0x202   :  { %v163_v25 = vadd.f32 1.0, %v1308_v24 }
 0x204   :  { %1309 = vrcp.f32 %v163_v25  ;;  %v175_v29 = vand.u32 2147483648, %v163_v25  ;;  %v173_v31 = vand.u32 2147483647, %v163_v25  ;;  %vm169_vm9 = vweird.f32 %v163_v25 }
 0x206   :  { %v176_v33 = vor.u32 1.1754944e-38, %v175_v29  ;;  %vm174_vm11 = vcmp.eq.f32.partialorder %v173_v31, 8.507059e+37 }
 0x20a   :  { %v1310_v26 = vpop.eup %1309 }
 0x20b   :  { %v165_v27 = vmul.f32 %v1310_v26, %v163_v25  ;;  %vm170_vm8 = vweird.f32 %v1310_v26 }
 0x20c   :  { %vm171_vm10 = vmor %vm169_vm9, %vm170_vm8 }
 0x20d   :  { %v166_v28 = vsub.f32 1.0, %v165_v27 }
 0x20f   :  { %v167_v30 = vmul.f32 %v1310_v26, %v166_v28 }
 0x211   :  { %v168_v32 = vadd.f32 %v1310_v26, %v167_v30 }
 0x213   :  { %v172_v34 = vsel %vm171_vm10, %v1310_v26, %v168_v32 }
 0x214   :  { %v177_v22 = vsel %vm174_vm11, %v176_v33, %v172_v34 }
 0x215   :  { %v184_v36 = vmul.f32 %v182_v35, %v177_v22 }
 0x217   :  { %189 = vrot.lane.b32.xlu2 %v184_v36, %s1423_s28 }
 0x271   :  { %v190_v37 = vpop.permute.xlu2 %189 }
 0x272   :  { %1242 = vmatmul.msk.f32.vlgmr.msra.gmra.mxu2 %vm50_vm12, %v190_v37  ;;  %1243 = vmatmul.msk.f32.vlgmr.msra.gmra.mxu3 %vm50_vm12, %v190_v37 }
 0x273   :  { %757 = vmatpush.msra.mxu2 %v1485_v3  ;;  %777 = vmatpush.msra.mxu3 %v1468_v0 }
 0x275   :  { %758 = vmatpush.msra.mxu2 %v1492_v4  ;;  %778 = vmatpush.msra.mxu3 %v1473_v1 }
 0x277   :  { %759 = vmatpush.msra.mxu2 %v1502_v6  ;;  %779 = vmatpush.msra.mxu3 %v1480_v2 }
 0x279   :  { %760 = vmatpush.msra.mxu2 %v1521_v9  ;;  %780 = vmatpush.msra.mxu3 %v1497_v5 }
 0x27b   :  { %761 = vmatpush.msra.mxu2 %v1538_v12  ;;  %781 = vmatpush.msra.mxu3 %v1516_v8 }
 0x27d   :  { %762 = vmatpush.msra.mxu2 %v1553_v15  ;;  %782 = vmatpush.msra.mxu3 %v1533_v11 }
 0x27f   :  { %763 = vmatpush.msra.mxu2 %v1567_v17  ;;  %783 = vmatpush.msra.mxu3 %v1548_v14 }
 0x281   :  { %764 = vmatpush.msra.mxu2 %v1576_v18  ;;  %784 = vmatpush.msra.mxu3 %v1562_v16 }
 0x2f5   :  { %v230_v39 = vpop.f32.mrf.mxu3  ;;  %v210_v43 = vpop.f32.mrf.mxu2 }
 0x2f6   :  { %v1686_v40 = vadd.f32 %v1241_v38, %v230_v39  ;;  %v233_v45 = vadd.f32 %v1240_v42, %v210_v43 }
 0x2f8   :  { %1311 = vtanh.f32 %v1686_v40  ;;  %v261_v47 = vadd.f32 %v259_v46, %v233_v45  ;;  %v236_v20 = vadd.f32 %v235_v19, %v233_v45 }
 0x2fa   :  { %v1245_v48 = vmul.f32 -1.442695, %v261_v47  ;;  %v1244_v7 = vmul.f32 -1.442695, %v236_v20 }
 0x2fc   :  { %1313 = vpow2.f32 %v1245_v48 }
 0x2fe   :  { %v1312_v41 = vpop.eup %1311 }
 0x2ff   :  { %284 = vrot.lane.b32.xlu1 %v1312_v41, %s1423_s28 }
 0x302   :  { %v1314_v49 = vpop.eup %1313 }
 0x303   :  { %v265_v50 = vadd.f32 1.0, %v1314_v49 }
 0x305   :  { %1315 = vrcp.f32 %v265_v50  ;;  %v277_v56 = vand.u32 2147483648, %v265_v50  ;;  %vm271_vm14 = vweird.f32 %v265_v50  ;;  %v275_v57 = vand.u32 2147483647, %v265_v50 }
 0x306   :  { %1317 = vpow2.f32 %v1244_v7 }
 0x307   :  { %v278_v59 = vor.u32 1.1754944e-38, %v277_v56  ;;  %vm276_vm0 = vcmp.eq.f32.partialorder %v275_v57, 8.507059e+37  ;;  %v1248_v57 = vld [vmem:[%s1963_s0 + $0x28] sm:$0xff] }
 0x30b   :  { %v1316_v51 = vpop.eup %1315 }
 0x30c   :  { %v267_v52 = vmul.f32 %v1316_v51, %v265_v50  ;;  %vm272_vm13 = vweird.f32 %v1316_v51  ;;  %v1318_v21 = vpop.eup %1317 }
 0x30d   :  { %vm273_vm15 = vmor %vm271_vm14, %vm272_vm13  ;;  %v240_v23 = vadd.f32 1.0, %v1318_v21 }
 0x30e   :  { %v268_v53 = vsub.f32 1.0, %v267_v52 }
 0x30f   :  { %1319 = vrcp.f32 %v240_v23  ;;  %v252_v29 = vand.u32 2147483648, %v240_v23  ;;  %vm246_vm2 = vweird.f32 %v240_v23  ;;  %v250_v30 = vand.u32 2147483647, %v240_v23 }
 0x310   :  { %v269_v54 = vmul.f32 %v1316_v51, %v268_v53 }
 0x311   :  { %v253_v32 = vor.u32 1.1754944e-38, %v252_v29  ;;  %vm251_vm4 = vcmp.eq.f32.partialorder %v250_v30, 8.507059e+37 }
 0x312   :  { %v270_v55 = vadd.f32 %v1316_v51, %v269_v54 }
 0x314   :  { %v274_v58 = vsel %vm273_vm15, %v1316_v51, %v270_v55 }
 0x315   :  { %v279_v62 = vsel %vm276_vm0, %v278_v59, %v274_v58  ;;  %v1320_v24 = vpop.eup %1319 }
 0x316   :  { %v242_v25 = vmul.f32 %v1320_v24, %v240_v23  ;;  %vm247_vm1 = vweird.f32 %v1320_v24 }
 0x317   :  { %vm248_vm3 = vmor %vm246_vm2, %vm247_vm1 }
 0x318   :  { %v243_v26 = vsub.f32 1.0, %v242_v25 }
 0x31a   :  { %v244_v27 = vmul.f32 %v1320_v24, %v243_v26 }
 0x31c   :  { %v245_v28 = vadd.f32 %v1320_v24, %v244_v27 }
 0x31e   :  { %v249_v31 = vsel %vm248_vm3, %v1320_v24, %v245_v28 }
 0x31f   :  { %v254_v33 = vsel %vm251_vm4, %v253_v32, %v249_v31 }
 0x320   :  { %v282_v34 = vmul.f32 %v254_v33, %v1653_v63 }
 0x371   :  { %v285_v60 = vpop.permute.xlu1 %284 }
 0x372   :  { %v287_v13 = vmul.f32 %v285_v60, %v279_v62  ;;  %v1247_v62 = vld [vmem:[%s1963_s0 + $0x20] sm:$0xff] }
 0x374   :  { %289 = vrot.lane.b32.xlu2 %v287_v13, %s1423_s28 }
 0x3ce   :  { %v290_v35 = vpop.permute.xlu2 %289 }
 0x3cf   :  { %v1697_v22 = vadd.f32 %v290_v35, %v282_v34 }
 0x3d1   :  { %1321 = vtanh.f32 %v1697_v22  ;;  %v293_v36 = vmul.f32 %v1697_v22, %v1651_v61  ;;  %v395_v38 = vmul.f32 %v1697_v22, %v1524_v10 }
 0x3d3   :  { %295 = vrot.lane.b32.xlu0 %v293_v36, %s1423_s28 }
 0x3d7   :  { %v1322_v37 = vpop.eup %1321 }
 0x3d8   :  { %320 = vrot.lane.b32.xlu1 %v1322_v37, %s1423_s28  ;;  %v374_v37 = vmul.f32 %v1697_v22, %v1647_v44 }
 0x3db   :  { %397 = vrot.lane.b32.xlu0 %v395_v38, %s1423_s28 }
 0x445   :  { %v296_v39 = vpop.permute.xlu0 %295 }
 0x446   :  { %v298_v63 = vadd.f32 %v296_v39, %v1686_v40 }
 0x448   :  { %v1246_v41 = vmul.f32 -1.442695, %v298_v63 }
 0x44a   :  { %1323 = vpow2.f32 %v1246_v41  ;;  %v321_v54 = vpop.permute.xlu1 %320 }
 0x44d   :  { %v398_v20 = vpop.permute.xlu0 %397 }
 0x450   :  { %v1324_v42 = vpop.eup %1323 }
 0x451   :  { %v302_v43 = vadd.f32 1.0, %v1324_v42 }
 0x453   :  { %1325 = vrcp.f32 %v302_v43  ;;  %v314_v48 = vand.u32 2147483648, %v302_v43  ;;  %v312_v50 = vand.u32 2147483647, %v302_v43  ;;  %vm308_vm6 = vweird.f32 %v302_v43 }
 0x455   :  { %v315_v52 = vor.u32 1.1754944e-38, %v314_v48  ;;  %vm313_vm8 = vcmp.eq.f32.partialorder %v312_v50, 8.507059e+37 }
 0x459   :  { %v1326_v45 = vpop.eup %1325 }
 0x45a   :  { %v304_v46 = vmul.f32 %v1326_v45, %v302_v43  ;;  %vm309_vm5 = vweird.f32 %v1326_v45 }
 0x45b   :  { %vm310_vm7 = vmor %vm308_vm6, %vm309_vm5 }
 0x45c   :  { %v305_v47 = vsub.f32 1.0, %v304_v46 }
 0x45e   :  { %v306_v49 = vmul.f32 %v1326_v45, %v305_v47 }
 0x460   :  { %v307_v51 = vadd.f32 %v1326_v45, %v306_v49 }
 0x462   :  { %v311_v53 = vsel %vm310_vm7, %v1326_v45, %v307_v51 }
 0x463   :  { %v316_v40 = vsel %vm313_vm8, %v315_v52, %v311_v53 }
 0x464   :  { %v323_v55 = vmul.f32 %v321_v54, %v316_v40 }
 0x466   :  { %328 = vrot.lane.b32.xlu2 %v323_v55, %s1423_s28 }
 0x4c0   :  { %v329_v56 = vpop.permute.xlu2 %328 }
 0x4c1   :  { %1249 = vmatmul.msk.f32.vlgmr.msrb.gmra.mxu0 %vm50_vm12, %v329_v56  ;;  %1250 = vmatmul.msk.f32.vlgmr.msrb.gmra.mxu1 %vm50_vm12, %v329_v56 }
 0x4c2   :  { %896 = vmatpush.msrb.mxu0 %v1485_v3  ;;  %916 = vmatpush.msrb.mxu1 %v1468_v0 }
 0x4c4   :  { %897 = vmatpush.msrb.mxu0 %v1492_v4  ;;  %917 = vmatpush.msrb.mxu1 %v1473_v1 }
 0x4c6   :  { %898 = vmatpush.msrb.mxu0 %v1502_v6  ;;  %918 = vmatpush.msrb.mxu1 %v1480_v2 }
 0x4c8   :  { %899 = vmatpush.msrb.mxu0 %v1521_v9  ;;  %919 = vmatpush.msrb.mxu1 %v1497_v5 }
 0x4ca   :  { %900 = vmatpush.msrb.mxu0 %v1538_v12  ;;  %920 = vmatpush.msrb.mxu1 %v1516_v8 }
 0x4cc   :  { %901 = vmatpush.msrb.mxu0 %v1553_v15  ;;  %921 = vmatpush.msrb.mxu1 %v1533_v11 }
 0x4ce   :  { %902 = vmatpush.msrb.mxu0 %v1567_v17  ;;  %922 = vmatpush.msrb.mxu1 %v1548_v14 }
 0x4d0   :  { %903 = vmatpush.msrb.mxu0 %v1576_v18  ;;  %923 = vmatpush.msrb.mxu1 %v1562_v16 }
 0x53e   :  { %v369_v58 = vpop.f32.mrf.mxu1  ;;  %v349_v13 = vpop.f32.mrf.mxu0 }
 0x53f   :  { %v1730_v59 = vadd.f32 %v1248_v57, %v369_v58  ;;  %v372_v19 = vadd.f32 %v1247_v62, %v349_v13 }
 0x541   :  { %1327 = vtanh.f32 %v1730_v59  ;;  %v400_v7 = vadd.f32 %v398_v20, %v372_v19  ;;  %v375_v38 = vadd.f32 %v374_v37, %v372_v19 }
 0x543   :  { %v1252_v21 = vmul.f32 -1.442695, %v400_v7  ;;  %v1251_v39 = vmul.f32 -1.442695, %v375_v38 }
 0x545   :  { %1329 = vpow2.f32 %v1252_v21 }
 0x547   :  { %v1328_v60 = vpop.eup %1327 }
 0x548   :  { %423 = vrot.lane.b32.xlu1 %v1328_v60, %s1423_s28 }
 0x54b   :  { %v1330_v23 = vpop.eup %1329 }
 0x54c   :  { %v404_v24 = vadd.f32 1.0, %v1330_v23 }
 0x54e   :  { %1331 = vrcp.f32 %v404_v24  ;;  %v416_v30 = vand.u32 2147483648, %v404_v24  ;;  %vm410_vm10 = vweird.f32 %v404_v24  ;;  %v414_v31 = vand.u32 2147483647, %v404_v24 }
 0x54f   :  { %1333 = vpow2.f32 %v1251_v39 }
 0x550   :  { %v417_v33 = vor.u32 1.1754944e-38, %v416_v30  ;;  %vm415_vm13 = vcmp.eq.f32.partialorder %v414_v31, 8.507059e+37 }
 0x554   :  { %v1332_v25 = vpop.eup %1331 }
 0x555   :  { %v406_v26 = vmul.f32 %v1332_v25, %v404_v24  ;;  %vm411_vm9 = vweird.f32 %v1332_v25  ;;  %v1334_v63 = vpop.eup %1333 }
 0x556   :  { %vm412_vm11 = vmor %vm410_vm10, %vm411_vm9  ;;  %v379_v41 = vadd.f32 1.0, %v1334_v63 }
 0x557   :  { %v407_v27 = vsub.f32 1.0, %v406_v26 }
 0x558   :  { %1335 = vrcp.f32 %v379_v41  ;;  %v391_v48 = vand.u32 2147483648, %v379_v41  ;;  %vm385_vm15 = vweird.f32 %v379_v41  ;;  %v389_v49 = vand.u32 2147483647, %v379_v41 }
 0x559   :  { %v408_v28 = vmul.f32 %v1332_v25, %v407_v27 }
 0x55a   :  { %v392_v51 = vor.u32 1.1754944e-38, %v391_v48  ;;  %vm390_vm1 = vcmp.eq.f32.partialorder %v389_v49, 8.507059e+37 }
 0x55b   :  { %v409_v29 = vadd.f32 %v1332_v25, %v408_v28 }
 0x55d   :  { %v413_v32 = vsel %vm412_vm11, %v1332_v25, %v409_v29 }
 0x55e   :  { %v418_v35 = vsel %vm415_vm13, %v417_v33, %v413_v32  ;;  %v1336_v42 = vpop.eup %1335 }
 0x55f   :  { %v381_v43 = vmul.f32 %v1336_v42, %v379_v41  ;;  %vm386_vm14 = vweird.f32 %v1336_v42 }
 0x560   :  { %vm387_vm0 = vmor %vm385_vm15, %vm386_vm14 }
 0x561   :  { %v382_v45 = vsub.f32 1.0, %v381_v43 }
 0x563   :  { %v383_v46 = vmul.f32 %v1336_v42, %v382_v45 }
 0x565   :  { %v384_v47 = vadd.f32 %v1336_v42, %v383_v46 }
 0x567   :  { %v388_v50 = vsel %vm387_vm0, %v1336_v42, %v384_v47 }
 0x568   :  { %v393_v52 = vsel %vm390_vm1, %v392_v51, %v388_v50 }
 0x569   :  { %v421_v53 = vmul.f32 %v393_v52, %v1697_v22 }
 0x5ba   :  { %v424_v34 = vpop.permute.xlu1 %423 }
 0x5bb   :  { %v426_v36 = vmul.f32 %v424_v34, %v418_v35 }
 0x5bd   :  { %428 = vrot.lane.b32.xlu2 %v426_v36, %s1423_s28 }
 0x617   :  { %v429_v54 = vpop.permute.xlu2 %428 }
 0x618   :  { %v1741_v40 = vadd.f32 %v429_v54, %v421_v53 }
 0x61a   :  { %1337 = vtanh.f32 %v1741_v40  ;;  %v432_v55 = vmul.f32 %v1741_v40, %v1651_v61  ;;  %v534_v57 = vmul.f32 %v1741_v40, %v1524_v10  ;;  %v513_v39 = vmul.f32 %v1741_v40, %v1647_v44 }
 0x61c   :  { %434 = vrot.lane.b32.xlu0 %v432_v55, %s1423_s28 }
 0x620   :  { %v1338_v56 = vpop.eup %1337 }
 0x621   :  { %459 = vrot.lane.b32.xlu1 %v1338_v56, %s1423_s28 }
 0x624   :  { %536 = vrot.lane.b32.xlu0 %v534_v57, %s1423_s28 }
 0x68e   :  { %v435_v58 = vpop.permute.xlu0 %434 }
 0x68f   :  { %v437_v22 = vadd.f32 %v435_v58, %v1730_v59 }
 0x691   :  { %v1253_v60 = vmul.f32 -1.442695, %v437_v22 }
 0x693   :  { %1339 = vpow2.f32 %v1253_v60  ;;  %v460_v28 = vpop.permute.xlu1 %459 }
 0x699   :  { %v1340_v62 = vpop.eup %1339 }
 0x69a   :  { %v441_v13 = vadd.f32 1.0, %v1340_v62 }
 0x69c   :  { %1341 = vrcp.f32 %v441_v13  ;;  %v453_v21 = vand.u32 2147483648, %v441_v13  ;;  %v451_v24 = vand.u32 2147483647, %v441_v13  ;;  %vm447_vm3 = vweird.f32 %v441_v13 }
 0x69e   :  { %v454_v26 = vor.u32 1.1754944e-38, %v453_v21  ;;  %vm452_vm5 = vcmp.eq.f32.partialorder %v451_v24, 8.507059e+37 }
 0x6a2   :  { %v1342_v19 = vpop.eup %1341 }
 0x6a3   :  { %v443_v20 = vmul.f32 %v1342_v19, %v441_v13  ;;  %vm448_vm2 = vweird.f32 %v1342_v19 }
 0x6a4   :  { %vm449_vm4 = vmor %vm447_vm3, %vm448_vm2 }
 0x6a5   :  { %v444_v7 = vsub.f32 1.0, %v443_v20 }
 0x6a7   :  { %v445_v23 = vmul.f32 %v1342_v19, %v444_v7 }
 0x6a9   :  { %v446_v25 = vadd.f32 %v1342_v19, %v445_v23 }
 0x6ab   :  { %v450_v27 = vsel %vm449_vm4, %v1342_v19, %v446_v25 }
 0x6ac   :  { %v455_v59 = vsel %vm452_vm5, %v454_v26, %v450_v27 }
 0x6ad   :  { %v462_v29 = vmul.f32 %v460_v28, %v455_v59 }
 0x6af   :  { %467 = vrot.lane.b32.xlu2 %v462_v29, %s1423_s28 }
 0x709   :  { %v468_v30 = vpop.permute.xlu2 %467 }
 0x70a   :  { %1256 = vmatmul.msk.f32.vlgmr.msrb.gmra.mxu2 %vm50_vm12, %v468_v30  ;;  %1257 = vmatmul.msk.f32.vlgmr.msrb.gmra.mxu3 %vm50_vm12, %v468_v30 }
 0x70b   :  { %1035 = vmatpush.msrb.mxu2 %v1485_v3  ;;  %1055 = vmatpush.msrb.mxu3 %v1468_v0  ;;  %v1255_v0 = vld [vmem:[%s1963_s0 + $0x38] sm:$0xff] }
 0x70d   :  { %1036 = vmatpush.msrb.mxu2 %v1492_v4  ;;  %1056 = vmatpush.msrb.mxu3 %v1473_v1  ;;  %v1254_v4 = vld [vmem:[%s1963_s0 + $0x30] sm:$0xff] }
 0x70f   :  { %1037 = vmatpush.msrb.mxu2 %v1502_v6  ;;  %1057 = vmatpush.msrb.mxu3 %v1480_v2 }
 0x711   :  { %1038 = vmatpush.msrb.mxu2 %v1521_v9  ;;  %1058 = vmatpush.msrb.mxu3 %v1497_v5 }
 0x713   :  { %1039 = vmatpush.msrb.mxu2 %v1538_v12  ;;  %1059 = vmatpush.msrb.mxu3 %v1516_v8  ;;  %v537_v8 = vpop.permute.xlu0 %536 }
 0x715   :  { %1040 = vmatpush.msrb.mxu2 %v1553_v15  ;;  %1060 = vmatpush.msrb.mxu3 %v1533_v11 }
 0x717   :  { %1041 = vmatpush.msrb.mxu2 %v1567_v17  ;;  %1061 = vmatpush.msrb.mxu3 %v1548_v14 }
 0x719   :  { %1042 = vmatpush.msrb.mxu2 %v1576_v18  ;;  %1062 = vmatpush.msrb.mxu3 %v1562_v16 }
 0x78d   :  { %v508_v1 = vpop.f32.mrf.mxu3  ;;  %v488_v5 = vpop.f32.mrf.mxu2 }
 0x78e   :  { %v1774_v2 = vadd.f32 %v1255_v0, %v508_v1  ;;  %v511_v6 = vadd.f32 %v1254_v4, %v488_v5 }
 0x790   :  { %1343 = vtanh.f32 %v1774_v2  ;;  %v539_v9 = vadd.f32 %v537_v8, %v511_v6  ;;  %v514_v63 = vadd.f32 %v513_v39, %v511_v6  ;;  %v1261_v6 = vld [vmem:[%s1963_s0 + $0x40] sm:$0xff] }
 0x792   :  { %v1259_v11 = vmul.f32 -1.442695, %v539_v9  ;;  %v1258_v41 = vmul.f32 -1.442695, %v514_v63 }
 0x794   :  { %1345 = vpow2.f32 %v1259_v11 }
 0x796   :  { %v1344_v3 = vpop.eup %1343 }
 0x797   :  { %562 = vrot.lane.b32.xlu1 %v1344_v3, %s1423_s28 }
 0x79a   :  { %v1346_v12 = vpop.eup %1345 }
 0x79b   :  { %v543_v14 = vadd.f32 1.0, %v1346_v12 }
 0x79d   :  { %1347 = vrcp.f32 %v543_v14  ;;  %v555_v32 = vand.u32 2147483648, %v543_v14  ;;  %vm549_vm7 = vweird.f32 %v543_v14  ;;  %v553_v33 = vand.u32 2147483647, %v543_v14 }
 0x79e   :  { %1349 = vpow2.f32 %v1258_v41 }
 0x79f   :  { %v556_v35 = vor.u32 1.1754944e-38, %v555_v32  ;;  %vm554_vm9 = vcmp.eq.f32.partialorder %v553_v33, 8.507059e+37 }
 0x7a3   :  { %v1348_v15 = vpop.eup %1347 }
 0x7a4   :  { %v545_v16 = vmul.f32 %v1348_v15, %v543_v14  ;;  %vm550_vm6 = vweird.f32 %v1348_v15  ;;  %v1350_v42 = vpop.eup %1349 }
 0x7a5   :  { %vm551_vm8 = vmor %vm549_vm7, %vm550_vm6  ;;  %v518_v43 = vadd.f32 1.0, %v1350_v42 }
 0x7a6   :  { %v546_v17 = vsub.f32 1.0, %v545_v16 }
 0x7a7   :  { %1351 = vrcp.f32 %v518_v43  ;;  %v530_v50 = vand.u32 2147483648, %v518_v43  ;;  %vm524_vm11 = vweird.f32 %v518_v43  ;;  %v528_v51 = vand.u32 2147483647, %v518_v43 }
 0x7a8   :  { %v547_v18 = vmul.f32 %v1348_v15, %v546_v17 }
 0x7a9   :  { %v531_v53 = vor.u32 1.1754944e-38, %v530_v50  ;;  %vm529_vm14 = vcmp.eq.f32.partialorder %v528_v51, 8.507059e+37 }
 0x7aa   :  { %v548_v31 = vadd.f32 %v1348_v15, %v547_v18 }
 0x7ac   :  { %v552_v34 = vsel %vm551_vm8, %v1348_v15, %v548_v31 }
 0x7ad   :  { %v557_v37 = vsel %vm554_vm9, %v556_v35, %v552_v34  ;;  %v1352_v45 = vpop.eup %1351 }
 0x7ae   :  { %v520_v46 = vmul.f32 %v1352_v45, %v518_v43  ;;  %vm525_vm10 = vweird.f32 %v1352_v45 }
 0x7af   :  { %vm526_vm13 = vmor %vm524_vm11, %vm525_vm10 }
 0x7b0   :  { %v521_v47 = vsub.f32 1.0, %v520_v46 }
 0x7b2   :  { %v522_v48 = vmul.f32 %v1352_v45, %v521_v47 }
 0x7b4   :  { %v523_v49 = vadd.f32 %v1352_v45, %v522_v48 }
 0x7b6   :  { %v527_v52 = vsel %vm526_vm13, %v1352_v45, %v523_v49 }
 0x7b7   :  { %v532_v54 = vsel %vm529_vm14, %v531_v53, %v527_v52 }
 0x7b8   :  { %v560_v55 = vmul.f32 %v532_v54, %v1741_v40 }
 0x809   :  { %v563_v36 = vpop.permute.xlu1 %562 }
 0x80a   :  { %v565_v38 = vmul.f32 %v563_v36, %v557_v37 }
 0x80c   :  { %567 = vrot.lane.b32.xlu2 %v565_v38, %s1423_s28 }
 0x866   :  { %v568_v56 = vpop.permute.xlu2 %567 }
 0x867   :  { %v1785_v57 = vadd.f32 %v568_v56, %v560_v55 }
 0x869   :  { %1353 = vtanh.f32 %v1785_v57  ;;  %v571_v58 = vmul.f32 %v1785_v57, %v1651_v61  ;;  %v673_v60 = vmul.f32 %v1785_v57, %v1524_v10  ;;  %v652_v41 = vmul.f32 %v1785_v57, %v1647_v44 }
 0x86b   :  { %573 = vrot.lane.b32.xlu0 %v571_v58, %s1423_s28 }
 0x86f   :  { %v1354_v22 = vpop.eup %1353 }
 0x870   :  { %598 = vrot.lane.b32.xlu1 %v1354_v22, %s1423_s28 }
 0x873   :  { %675 = vrot.lane.b32.xlu0 %v673_v60, %s1423_s28 }
 0x8dd   :  { %v574_v62 = vpop.permute.xlu0 %573 }
 0x8de   :  { %v576_v40 = vadd.f32 %v574_v62, %v1774_v2  ;;  %v1262_v2 = vld [vmem:[%s1963_s0 + $0x48] sm:$0xff] }
 0x8e0   :  { %v1260_v13 = vmul.f32 -1.442695, %v576_v40 }
 0x8e2   :  { %1355 = vpow2.f32 %v1260_v13  ;;  %v599_v29 = vpop.permute.xlu1 %598 }
 0x8e5   :  { %v676_v11 = vpop.permute.xlu0 %675 }
 0x8e8   :  { %v1356_v19 = vpop.eup %1355 }
 0x8e9   :  { %v580_v20 = vadd.f32 1.0, %v1356_v19 }
 0x8eb   :  { %1357 = vrcp.f32 %v580_v20  ;;  %v592_v24 = vand.u32 2147483648, %v580_v20  ;;  %v590_v26 = vand.u32 2147483647, %v580_v20  ;;  %vm586_vm0 = vweird.f32 %v580_v20 }
 0x8ed   :  { %v593_v28 = vor.u32 1.1754944e-38, %v592_v24  ;;  %vm591_vm2 = vcmp.eq.f32.partialorder %v590_v26, 8.507059e+37 }
 0x8f1   :  { %v1358_v7 = vpop.eup %1357 }
 0x8f2   :  { %v582_v21 = vmul.f32 %v1358_v7, %v580_v20  ;;  %vm587_vm15 = vweird.f32 %v1358_v7 }
 0x8f3   :  { %vm588_vm1 = vmor %vm586_vm0, %vm587_vm15 }
 0x8f4   :  { %v583_v23 = vsub.f32 1.0, %v582_v21 }
 0x8f6   :  { %v584_v25 = vmul.f32 %v1358_v7, %v583_v23 }
 0x8f8   :  { %v585_v27 = vadd.f32 %v1358_v7, %v584_v25 }
 0x8fa   :  { %v589_v59 = vsel %vm588_vm1, %v1358_v7, %v585_v27 }
 0x8fb   :  { %v594_v30 = vsel %vm591_vm2, %v593_v28, %v589_v59 }
 0x8fc   :  { %v601_v0 = vmul.f32 %v599_v29, %v594_v30 }
 0x8fe   :  { %606 = vrot.lane.b32.xlu2 %v601_v0, %s1423_s28 }
 0x958   :  { %v607_v1 = vpop.permute.xlu2 %606 }
 0x959   :  { %1263 = vmatmul.msk.f32.vlgmr.msra.gmra.mxu0 %vm50_vm12, %v607_v1  ;;  %1264 = vmatmul.msk.f32.vlgmr.msra.gmra.mxu1 %vm50_vm12, %v607_v1 }
 0x9d6   :  { %v647_v3 = vpop.f32.mrf.mxu1  ;;  %v627_v8 = vpop.f32.mrf.mxu0 }
 0x9d7   :  { %v1802_v4 = vadd.f32 %v1262_v2, %v647_v3  ;;  %v650_v9 = vadd.f32 %v1261_v6, %v627_v8 }
 0x9d9   :  { %1359 = vtanh.f32 %v1802_v4  ;;  %v678_v12 = vadd.f32 %v676_v11, %v650_v9  ;;  %v653_v42 = vadd.f32 %v652_v41, %v650_v9  ;;  %v1268_v9 = vld [vmem:[%s1963_s0 + $0x50] sm:$0xff] }
 0x9db   :  { %v1266_v14 = vmul.f32 -1.442695, %v678_v12  ;;  %v1265_v43 = vmul.f32 -1.442695, %v653_v42 }
 0x9dd   :  { %1361 = vpow2.f32 %v1266_v14 }
 0x9df   :  { %v1360_v5 = vpop.eup %1359 }
 0x9e0   :  { %701 = vrot.lane.b32.xlu1 %v1360_v5, %s1423_s28 }
 0x9e3   :  { %v1362_v15 = vpop.eup %1361 }
 0x9e4   :  { %v682_v16 = vadd.f32 1.0, %v1362_v15 }
 0x9e6   :  { %1363 = vrcp.f32 %v682_v16  ;;  %v694_v34 = vand.u32 2147483648, %v682_v16  ;;  %vm688_vm4 = vweird.f32 %v682_v16  ;;  %v692_v35 = vand.u32 2147483647, %v682_v16 }
 0x9e7   :  { %1365 = vpow2.f32 %v1265_v43 }
 0x9e8   :  { %v695_v37 = vor.u32 1.1754944e-38, %v694_v34  ;;  %vm693_vm6 = vcmp.eq.f32.partialorder %v692_v35, 8.507059e+37 }
 0x9ec   :  { %v1364_v17 = vpop.eup %1363 }
 0x9ed   :  { %v684_v18 = vmul.f32 %v1364_v17, %v682_v16  ;;  %vm689_vm3 = vweird.f32 %v1364_v17  ;;  %v1366_v45 = vpop.eup %1365 }
 0x9ee   :  { %vm690_vm5 = vmor %vm688_vm4, %vm689_vm3  ;;  %v657_v46 = vadd.f32 1.0, %v1366_v45 }
 0x9ef   :  { %v685_v31 = vsub.f32 1.0, %v684_v18 }
 0x9f0   :  { %1367 = vrcp.f32 %v657_v46  ;;  %v669_v52 = vand.u32 2147483648, %v657_v46  ;;  %vm663_vm8 = vweird.f32 %v657_v46  ;;  %v667_v53 = vand.u32 2147483647, %v657_v46 }
 0x9f1   :  { %v686_v32 = vmul.f32 %v1364_v17, %v685_v31 }
 0x9f2   :  { %v670_v55 = vor.u32 1.1754944e-38, %v669_v52  ;;  %vm668_vm10 = vcmp.eq.f32.partialorder %v667_v53, 8.507059e+37 }
 0x9f3   :  { %v687_v33 = vadd.f32 %v1364_v17, %v686_v32 }
 0x9f5   :  { %v691_v36 = vsel %vm690_vm5, %v1364_v17, %v687_v33 }
 0x9f6   :  { %v696_v39 = vsel %vm693_vm6, %v695_v37, %v691_v36  ;;  %v1368_v47 = vpop.eup %1367 }
 0x9f7   :  { %v659_v48 = vmul.f32 %v1368_v47, %v657_v46  ;;  %vm664_vm7 = vweird.f32 %v1368_v47 }
 0x9f8   :  { %vm665_vm9 = vmor %vm663_vm8, %vm664_vm7 }
 0x9f9   :  { %v660_v49 = vsub.f32 1.0, %v659_v48 }
 0x9fb   :  { %v661_v50 = vmul.f32 %v1368_v47, %v660_v49 }
 0x9fd   :  { %v662_v51 = vadd.f32 %v1368_v47, %v661_v50 }
 0x9ff   :  { %v666_v54 = vsel %vm665_vm9, %v1368_v47, %v662_v51 }
 0xa00   :  { %v671_v56 = vsel %vm668_vm10, %v670_v55, %v666_v54 }
 0xa01   :  { %v699_v58 = vmul.f32 %v671_v56, %v1785_v57 }
 0xa52   :  { %v702_v38 = vpop.permute.xlu1 %701 }
 0xa53   :  { %v704_v63 = vmul.f32 %v702_v38, %v696_v39 }
 0xa55   :  { %706 = vrot.lane.b32.xlu2 %v704_v63, %s1423_s28 }
 0xaaf   :  { %v707_v22 = vpop.permute.xlu2 %706 }
 0xab0   :  { %v1813_v60 = vadd.f32 %v707_v22, %v699_v58 }
 0xab2   :  { %1369 = vtanh.f32 %v1813_v60  ;;  %v710_v62 = vmul.f32 %v1813_v60, %v1651_v61  ;;  %v812_v13 = vmul.f32 %v1813_v60, %v1524_v10  ;;  %v791_v43 = vmul.f32 %v1813_v60, %v1647_v44 }
 0xab4   :  { %712 = vrot.lane.b32.xlu0 %v710_v62, %s1423_s28 }
 0xab8   :  { %v1370_v40 = vpop.eup %1369 }
 0xab9   :  { %737 = vrot.lane.b32.xlu1 %v1370_v40, %s1423_s28 }
 0xabc   :  { %814 = vrot.lane.b32.xlu0 %v812_v13, %s1423_s28 }
 0xb26   :  { %v713_v19 = vpop.permute.xlu0 %712 }
 0xb27   :  { %v715_v57 = vadd.f32 %v713_v19, %v1802_v4  ;;  %v1269_v4 = vld [vmem:[%s1963_s0 + $0x58] sm:$0xff] }
 0xb29   :  { %v1267_v20 = vmul.f32 -1.442695, %v715_v57 }
 0xb2b   :  { %1371 = vpow2.f32 %v1267_v20  ;;  %v738_v0 = vpop.permute.xlu1 %737 }
 0xb2e   :  { %v815_v14 = vpop.permute.xlu0 %814 }
 0xb31   :  { %v1372_v7 = vpop.eup %1371 }
 0xb32   :  { %v719_v21 = vadd.f32 1.0, %v1372_v7 }
 0xb34   :  { %1373 = vrcp.f32 %v719_v21  ;;  %v731_v26 = vand.u32 2147483648, %v719_v21  ;;  %v729_v28 = vand.u32 2147483647, %v719_v21  ;;  %vm725_vm13 = vweird.f32 %v719_v21 }
 0xb36   :  { %v732_v29 = vor.u32 1.1754944e-38, %v731_v26  ;;  %vm730_vm15 = vcmp.eq.f32.partialorder %v729_v28, 8.507059e+37 }
 0xb3a   :  { %v1374_v23 = vpop.eup %1373 }
 0xb3b   :  { %v721_v24 = vmul.f32 %v1374_v23, %v719_v21  ;;  %vm726_vm11 = vweird.f32 %v1374_v23 }
 0xb3c   :  { %vm727_vm14 = vmor %vm725_vm13, %vm726_vm11 }
 0xb3d   :  { %v722_v25 = vsub.f32 1.0, %v721_v24 }
 0xb3f   :  { %v723_v27 = vmul.f32 %v1374_v23, %v722_v25 }
 0xb41   :  { %v724_v59 = vadd.f32 %v1374_v23, %v723_v27 }
 0xb43   :  { %v728_v30 = vsel %vm727_vm14, %v1374_v23, %v724_v59 }
 0xb44   :  { %v733_v1 = vsel %vm730_vm15, %v732_v29, %v728_v30 }
 0xb45   :  { %v740_v2 = vmul.f32 %v738_v0, %v733_v1 }
 0xb47   :  { %745 = vrot.lane.b32.xlu2 %v740_v2, %s1423_s28 }
 0xba1   :  { %v746_v3 = vpop.permute.xlu2 %745 }
 0xba2   :  { %1270 = vmatmul.msk.f32.vlgmr.msra.gmra.mxu2 %vm50_vm12, %v746_v3  ;;  %1271 = vmatmul.msk.f32.vlgmr.msra.gmra.mxu3 %vm50_vm12, %v746_v3 }
 0xc25   :  { %v786_v5 = vpop.f32.mrf.mxu3  ;;  %v766_v11 = vpop.f32.mrf.mxu2 }
 0xc26   :  { %v1830_v6 = vadd.f32 %v1269_v4, %v786_v5  ;;  %v789_v12 = vadd.f32 %v1268_v9, %v766_v11 }
 0xc28   :  { %1375 = vtanh.f32 %v1830_v6  ;;  %v817_v15 = vadd.f32 %v815_v14, %v789_v12  ;;  %v792_v45 = vadd.f32 %v791_v43, %v789_v12  ;;  %v1275_v12 = vld [vmem:[%s1963_s0 + $0x60] sm:$0xff] }
 0xc2a   :  { %v1273_v16 = vmul.f32 -1.442695, %v817_v15  ;;  %v1272_v46 = vmul.f32 -1.442695, %v792_v45 }
 0xc2c   :  { %1377 = vpow2.f32 %v1273_v16 }
 0xc2e   :  { %v1376_v8 = vpop.eup %1375 }
 0xc2f   :  { %840 = vrot.lane.b32.xlu1 %v1376_v8, %s1423_s28 }
 0xc32   :  { %v1378_v17 = vpop.eup %1377 }
 0xc33   :  { %v821_v18 = vadd.f32 1.0, %v1378_v17 }
 0xc35   :  { %1379 = vrcp.f32 %v821_v18  ;;  %v833_v36 = vand.u32 2147483648, %v821_v18  ;;  %vm827_vm1 = vweird.f32 %v821_v18  ;;  %v831_v37 = vand.u32 2147483647, %v821_v18 }
 0xc36   :  { %1381 = vpow2.f32 %v1272_v46 }
 0xc37   :  { %v834_v39 = vor.u32 1.1754944e-38, %v833_v36  ;;  %vm832_vm3 = vcmp.eq.f32.partialorder %v831_v37, 8.507059e+37 }
 0xc3b   :  { %v1380_v31 = vpop.eup %1379 }
 0xc3c   :  { %v823_v32 = vmul.f32 %v1380_v31, %v821_v18  ;;  %vm828_vm0 = vweird.f32 %v1380_v31  ;;  %v1382_v47 = vpop.eup %1381 }
 0xc3d   :  { %vm829_vm2 = vmor %vm827_vm1, %vm828_vm0  ;;  %v796_v48 = vadd.f32 1.0, %v1382_v47 }
 0xc3e   :  { %v824_v33 = vsub.f32 1.0, %v823_v32 }
 0xc3f   :  { %1383 = vrcp.f32 %v796_v48  ;;  %v808_v54 = vand.u32 2147483648, %v796_v48  ;;  %vm802_vm5 = vweird.f32 %v796_v48  ;;  %v806_v55 = vand.u32 2147483647, %v796_v48 }
 0xc40   :  { %v825_v34 = vmul.f32 %v1380_v31, %v824_v33 }
 0xc41   :  { %v809_v58 = vor.u32 1.1754944e-38, %v808_v54  ;;  %vm807_vm7 = vcmp.eq.f32.partialorder %v806_v55, 8.507059e+37 }
 0xc42   :  { %v826_v35 = vadd.f32 %v1380_v31, %v825_v34 }
 0xc44   :  { %v830_v38 = vsel %vm829_vm2, %v1380_v31, %v826_v35 }
 0xc45   :  { %v835_v41 = vsel %vm832_vm3, %v834_v39, %v830_v38  ;;  %v1384_v49 = vpop.eup %1383 }
 0xc46   :  { %v798_v50 = vmul.f32 %v1384_v49, %v796_v48  ;;  %vm803_vm4 = vweird.f32 %v1384_v49 }
 0xc47   :  { %vm804_vm6 = vmor %vm802_vm5, %vm803_vm4 }
 0xc48   :  { %v799_v51 = vsub.f32 1.0, %v798_v50 }
 0xc4a   :  { %v800_v52 = vmul.f32 %v1384_v49, %v799_v51 }
 0xc4c   :  { %v801_v53 = vadd.f32 %v1384_v49, %v800_v52 }
 0xc4e   :  { %v805_v56 = vsel %vm804_vm6, %v1384_v49, %v801_v53 }
 0xc4f   :  { %v810_v22 = vsel %vm807_vm7, %v809_v58, %v805_v56 }
 0xc50   :  { %v838_v62 = vmul.f32 %v810_v22, %v1813_v60 }
 0xca1   :  { %v841_v63 = vpop.permute.xlu1 %840 }
 0xca2   :  { %v843_v42 = vmul.f32 %v841_v63, %v835_v41 }
 0xca4   :  { %845 = vrot.lane.b32.xlu2 %v843_v42, %s1423_s28 }
 0xcfe   :  { %v846_v40 = vpop.permute.xlu2 %845 }
 0xcff   :  { %v1841_v13 = vadd.f32 %v846_v40, %v838_v62 }
 0xd01   :  { %1385 = vtanh.f32 %v1841_v13  ;;  %v849_v19 = vmul.f32 %v1841_v13, %v1651_v61  ;;  %v951_v20 = vmul.f32 %v1841_v13, %v1524_v10  ;;  %v930_v46 = vmul.f32 %v1841_v13, %v1647_v44 }
 0xd03   :  { %851 = vrot.lane.b32.xlu0 %v849_v19, %s1423_s28 }
 0xd07   :  { %v1386_v57 = vpop.eup %1385 }
 0xd08   :  { %876 = vrot.lane.b32.xlu1 %v1386_v57, %s1423_s28 }
 0xd0b   :  { %953 = vrot.lane.b32.xlu0 %v951_v20, %s1423_s28 }
 0xd75   :  { %v852_v7 = vpop.permute.xlu0 %851 }
 0xd76   :  { %v854_v60 = vadd.f32 %v852_v7, %v1830_v6  ;;  %v1276_v6 = vld [vmem:[%s1963_s0 + $0x68] sm:$0xff] }
 0xd78   :  { %v1274_v21 = vmul.f32 -1.442695, %v854_v60 }
 0xd7a   :  { %1387 = vpow2.f32 %v1274_v21  ;;  %v877_v2 = vpop.permute.xlu1 %876 }
 0xd7d   :  { %v954_v16 = vpop.permute.xlu0 %953 }
 0xd80   :  { %v1388_v23 = vpop.eup %1387 }
 0xd81   :  { %v858_v24 = vadd.f32 1.0, %v1388_v23 }
 0xd83   :  { %1389 = vrcp.f32 %v858_v24  ;;  %v870_v28 = vand.u32 2147483648, %v858_v24  ;;  %v868_v29 = vand.u32 2147483647, %v858_v24  ;;  %vm864_vm9 = vweird.f32 %v858_v24 }
 0xd85   :  { %v871_v0 = vor.u32 1.1754944e-38, %v870_v28  ;;  %vm869_vm11 = vcmp.eq.f32.partialorder %v868_v29, 8.507059e+37 }
 0xd89   :  { %v1390_v25 = vpop.eup %1389 }
 0xd8a   :  { %v860_v26 = vmul.f32 %v1390_v25, %v858_v24  ;;  %vm865_vm8 = vweird.f32 %v1390_v25 }
 0xd8b   :  { %vm866_vm10 = vmor %vm864_vm9, %vm865_vm8 }
 0xd8c   :  { %v861_v27 = vsub.f32 1.0, %v860_v26 }
 0xd8e   :  { %v862_v59 = vmul.f32 %v1390_v25, %v861_v27 }
 0xd90   :  { %v863_v30 = vadd.f32 %v1390_v25, %v862_v59 }
 0xd92   :  { %v867_v1 = vsel %vm866_vm10, %v1390_v25, %v863_v30 }
 0xd93   :  { %v872_v3 = vsel %vm869_vm11, %v871_v0, %v867_v1 }
 0xd94   :  { %v879_v4 = vmul.f32 %v877_v2, %v872_v3 }
 0xd96   :  { %884 = vrot.lane.b32.xlu2 %v879_v4, %s1423_s28 }
 0xdf0   :  { %v885_v5 = vpop.permute.xlu2 %884 }
 0xdf1   :  { %1277 = vmatmul.msk.f32.vlgmr.msrb.gmra.mxu0 %vm50_vm12, %v885_v5  ;;  %1278 = vmatmul.msk.f32.vlgmr.msrb.gmra.mxu1 %vm50_vm12, %v885_v5 }
 0xe6e   :  { %v925_v8 = vpop.f32.mrf.mxu1  ;;  %v905_v14 = vpop.f32.mrf.mxu0 }
 0xe6f   :  { %v1858_v9 = vadd.f32 %v1276_v6, %v925_v8  ;;  %v928_v15 = vadd.f32 %v1275_v12, %v905_v14  ;;  %v1283_v8 = vld [vmem:[%s1963_s0 + $0x78] sm:$0xff]  ;;  %v1282_v14 = vld [vmem:[%s1963_s0 + $0x70] sm:$0xff] }
 0xe71   :  { %1391 = vtanh.f32 %v1858_v9  ;;  %v956_v17 = vadd.f32 %v954_v16, %v928_v15  ;;  %v931_v47 = vadd.f32 %v930_v46, %v928_v15 }
 0xe73   :  { %v1280_v18 = vmul.f32 -1.442695, %v956_v17  ;;  %v1279_v48 = vmul.f32 -1.442695, %v931_v47 }
 0xe75   :  { %1393 = vpow2.f32 %v1280_v18 }
 0xe77   :  { %v1392_v11 = vpop.eup %1391 }
 0xe78   :  { %979 = vrot.lane.b32.xlu1 %v1392_v11, %s1423_s28 }
 0xe7b   :  { %v1394_v31 = vpop.eup %1393 }
 0xe7c   :  { %v960_v32 = vadd.f32 1.0, %v1394_v31 }
 0xe7e   :  { %1395 = vrcp.f32 %v960_v32  ;;  %v972_v38 = vand.u32 2147483648, %v960_v32  ;;  %vm966_vm14 = vweird.f32 %v960_v32  ;;  %v970_v39 = vand.u32 2147483647, %v960_v32 }
 0xe7f   :  { %1397 = vpow2.f32 %v1279_v48 }
 0xe80   :  { %v973_v41 = vor.u32 1.1754944e-38, %v972_v38  ;;  %vm971_vm0 = vcmp.eq.f32.partialorder %v970_v39, 8.507059e+37 }
 0xe84   :  { %v1396_v33 = vpop.eup %1395 }
 0xe85   :  { %v962_v34 = vmul.f32 %v1396_v33, %v960_v32  ;;  %vm967_vm13 = vweird.f32 %v1396_v33  ;;  %v1398_v49 = vpop.eup %1397 }
 0xe86   :  { %vm968_vm15 = vmor %vm966_vm14, %vm967_vm13  ;;  %v935_v50 = vadd.f32 1.0, %v1398_v49 }
 0xe87   :  { %v963_v35 = vsub.f32 1.0, %v962_v34 }
 0xe88   :  { %1399 = vrcp.f32 %v935_v50  ;;  %v947_v56 = vand.u32 2147483648, %v935_v50  ;;  %vm941_vm2 = vweird.f32 %v935_v50  ;;  %v945_v58 = vand.u32 2147483647, %v935_v50 }
 0xe89   :  { %v964_v36 = vmul.f32 %v1396_v33, %v963_v35 }
 0xe8a   :  { %v948_v62 = vor.u32 1.1754944e-38, %v947_v56  ;;  %vm946_vm4 = vcmp.eq.f32.partialorder %v945_v58, 8.507059e+37 }
 0xe8b   :  { %v965_v37 = vadd.f32 %v1396_v33, %v964_v36 }
 0xe8d   :  { %v969_v63 = vsel %vm968_vm15, %v1396_v33, %v965_v37 }
 0xe8e   :  { %v974_v43 = vsel %vm971_vm0, %v973_v41, %v969_v63  ;;  %v1400_v51 = vpop.eup %1399 }
 0xe8f   :  { %v937_v52 = vmul.f32 %v1400_v51, %v935_v50  ;;  %vm942_vm1 = vweird.f32 %v1400_v51 }
 0xe90   :  { %vm943_vm3 = vmor %vm941_vm2, %vm942_vm1 }
 0xe91   :  { %v938_v53 = vsub.f32 1.0, %v937_v52 }
 0xe93   :  { %v939_v54 = vmul.f32 %v1400_v51, %v938_v53 }
 0xe95   :  { %v940_v55 = vadd.f32 %v1400_v51, %v939_v54 }
 0xe97   :  { %v944_v22 = vsel %vm943_vm3, %v1400_v51, %v940_v55 }
 0xe98   :  { %v949_v40 = vsel %vm946_vm4, %v948_v62, %v944_v22 }
 0xe99   :  { %v977_v19 = vmul.f32 %v949_v40, %v1841_v13 }
 0xeea   :  { %v980_v42 = vpop.permute.xlu1 %979 }
 0xeeb   :  { %v982_v45 = vmul.f32 %v980_v42, %v974_v43 }
 0xeed   :  { %984 = vrot.lane.b32.xlu2 %v982_v45, %s1423_s28 }
 0xf47   :  { %v985_v57 = vpop.permute.xlu2 %984 }
 0xf48   :  { %v1869_v20 = vadd.f32 %v985_v57, %v977_v19 }
 0xf4a   :  { %1401 = vtanh.f32 %v1869_v20  ;;  %v988_v7 = vmul.f32 %v1869_v20, %v1651_v61  ;;  %v1090_v21 = vmul.f32 %v1869_v20, %v1524_v10  ;;  %v1069_v47 = vmul.f32 %v1869_v20, %v1647_v44 }
 0xf4c   :  { %990 = vrot.lane.b32.xlu0 %v988_v7, %s1423_s28 }
 0xf50   :  { %v1402_v60 = vpop.eup %1401 }
 0xf51   :  { %1015 = vrot.lane.b32.xlu1 %v1402_v60, %s1423_s28 }
 0xf54   :  { %1092 = vrot.lane.b32.xlu0 %v1090_v21, %s1423_s28 }
 0xfbe   :  { %v991_v23 = vpop.permute.xlu0 %990 }
 0xfbf   :  { %v993_v13 = vadd.f32 %v991_v23, %v1858_v9 }
 0xfc1   :  { %v1281_v24 = vmul.f32 -1.442695, %v993_v13 }
 0xfc3   :  { %1403 = vpow2.f32 %v1281_v24  ;;  %v1016_v3 = vpop.permute.xlu1 %1015  ;;  %v1165_v24 = vld [vmem:[%s1965_s3 + $0x38] sm:$0xff] }
 0xfc4   :  { %1183 = vmatpush.msra.mxu0 %v1165_v24 }
 0xfc6   :  { %v1093_v17 = vpop.permute.xlu0 %1092 }
 0xfc9   :  { %v1404_v25 = vpop.eup %1403 }
 0xfca   :  { %v997_v26 = vadd.f32 1.0, %v1404_v25 }
 0xfcc   :  { %1405 = vrcp.f32 %v997_v26  ;;  %v1009_v29 = vand.u32 2147483648, %v997_v26  ;;  %v1007_v0 = vand.u32 2147483647, %v997_v26  ;;  %vm1003_vm6 = vweird.f32 %v997_v26 }
 0xfce   :  { %v1010_v10 = vor.u32 1.1754944e-38, %v1009_v29  ;;  %vm1008_vm8 = vcmp.eq.f32.partialorder %v1007_v0, 8.507059e+37  ;;  %v1159_v29 = vld [vmem:[%s1965_s3 + $0x8] sm:$0xff]  ;;  %v1158_v0 = vld [vmem:[%s1965_s3] sm:$0xff] }
 0xfd2   :  { %v1406_v27 = vpop.eup %1405 }
 0xfd3   :  { %v999_v28 = vmul.f32 %v1406_v27, %v997_v26  ;;  %vm1004_vm5 = vweird.f32 %v1406_v27  ;;  %v1162_v26 = vld [vmem:[%s1965_s3 + $0x20] sm:$0xff] }
 0xfd4   :  { %vm1005_vm7 = vmor %vm1003_vm6, %vm1004_vm5  ;;  %vm1231_vm6 = vcmask 7168  }
 0xfd5   :  { %v1000_v59 = vsub.f32 1.0, %v999_v28  ;;  %v1160_v28 = vld [vmem:[%s1965_s3 + $0x10] sm:$0xff] }
 0xfd7   :  { %v1001_v30 = vmul.f32 %v1406_v27, %v1000_v59 }
 0xfd9   :  { %v1002_v1 = vadd.f32 %v1406_v27, %v1001_v30 }
 0xfdb   :  { %v1006_v2 = vsel %vm1005_vm7, %v1406_v27, %v1002_v1  ;;  %v1161_v27 = vld [vmem:[%s1965_s3 + $0x18] sm:$0xff] }
 0xfdc   :  { %v1011_v4 = vsel %vm1008_vm8, %v1010_v10, %v1006_v2 }
 0xfdd   :  { %v1018_v5 = vmul.f32 %v1016_v3, %v1011_v4 }
 0xfdf   :  { %1023 = vrot.lane.b32.xlu2 %v1018_v5, %s1423_s28 }
0x1039   :  { %v1024_v6 = vpop.permute.xlu2 %1023 }
0x103a   :  { %1284 = vmatmul.msk.f32.vlgmr.msrb.gmra.mxu2 %vm50_vm12, %v1024_v6  ;;  %1285 = vmatmul.msk.f32.vlgmr.msrb.gmra.mxu3 %vm50_vm12, %v1024_v6 }
0x10bd   :  { %v1064_v9 = vpop.f32.mrf.mxu3  ;;  %v1044_v15 = vpop.f32.mrf.mxu2 }
0x10be   :  { %v1886_v11 = vadd.f32 %v1283_v8, %v1064_v9  ;;  %v1067_v16 = vadd.f32 %v1282_v14, %v1044_v15  ;;  %v1203_v15 = vld [vmem:[%s1966_s5 + $0x38] sm:$0xff] }
0x10bf   :  { %1219 = vmatpush.msra.mxu1 %v1203_v15 }
0x10c0   :  { %1407 = vtanh.f32 %v1886_v11  ;;  %v1095_v18 = vadd.f32 %v1093_v17, %v1067_v16  ;;  %v1070_v48 = vadd.f32 %v1069_v47, %v1067_v16  ;;  %v1202_v16 = vld [vmem:[%s1966_s5 + $0x30] sm:$0xff]  ;;  %v1201_v17 = vld [vmem:[%s1966_s5 + $0x28] sm:$0xff] }
0x10c1   :  { %1220 = vmatpush.msra.mxu1 %v1202_v16 }
0x10c2   :  { %v1287_v31 = vmul.f32 -1.442695, %v1095_v18  ;;  %v1286_v49 = vmul.f32 -1.442695, %v1070_v48  ;;  %v1200_v18 = vld [vmem:[%s1966_s5 + $0x20] sm:$0xff] }
0x10c3   :  { %1221 = vmatpush.msra.mxu1 %v1201_v17 }
0x10c4   :  { %1409 = vpow2.f32 %v1287_v31  ;;  %v1199_v31 = vld [vmem:[%s1966_s5 + $0x18] sm:$0xff] }
0x10c5   :  { %1222 = vmatpush.msra.mxu1 %v1200_v18 }
0x10c6   :  { %v1408_v12 = vpop.eup %1407 }
0x10c7   :  { %1118 = vrot.lane.b32.xlu1 %v1408_v12, %s1423_s28  ;;  %1223 = vmatpush.msra.mxu1 %v1199_v31 }
0x10ca   :  { %v1410_v32 = vpop.eup %1409 }
0x10cb   :  { %v1099_v33 = vadd.f32 1.0, %v1410_v32 }
0x10cd   :  { %1411 = vrcp.f32 %v1099_v33  ;;  %v1111_v39 = vand.u32 2147483648, %v1099_v33  ;;  %vm1105_vm10 = vweird.f32 %v1099_v33  ;;  %v1109_v63 = vand.u32 2147483647, %v1099_v33 }
0x10ce   :  { %1413 = vpow2.f32 %v1286_v49 }
0x10cf   :  { %v1112_v42 = vor.u32 1.1754944e-38, %v1111_v39  ;;  %vm1110_vm13 = vcmp.eq.f32.partialorder %v1109_v63, 8.507059e+37 }
0x10d3   :  { %v1412_v34 = vpop.eup %1411 }
0x10d4   :  { %v1101_v35 = vmul.f32 %v1412_v34, %v1099_v33  ;;  %vm1106_vm9 = vweird.f32 %v1412_v34  ;;  %v1414_v50 = vpop.eup %1413  ;;  %v1198_v33 = vld [vmem:[%s1966_s5 + $0x10] sm:$0xff] }
0x10d5   :  { %vm1107_vm11 = vmor %vm1105_vm10, %vm1106_vm9  ;;  %v1074_v51 = vadd.f32 1.0, %v1414_v50  ;;  %1224 = vmatpush.msra.mxu1 %v1198_v33 }
0x10d6   :  { %v1102_v36 = vsub.f32 1.0, %v1101_v35  ;;  %v1196_v35 = vld [vmem:[%s1966_s5] sm:$0xff] }
0x10d7   :  { %1415 = vrcp.f32 %v1074_v51  ;;  %v1086_v58 = vand.u32 2147483648, %v1074_v51  ;;  %vm1080_vm15 = vweird.f32 %v1074_v51  ;;  %v1084_v22 = vand.u32 2147483647, %v1074_v51 }
0x10d8   :  { %v1103_v37 = vmul.f32 %v1412_v34, %v1102_v36  ;;  %v12_v36 = vstv %s1967_s6 }
0x10d9   :  { %v1087_v40 = vor.u32 1.1754944e-38, %v1086_v58  ;;  %vm1085_vm1 = vcmp.eq.f32.partialorder %v1084_v22, 8.507059e+37  ;;  %13 = vst [vmem:[#allocation2] sm:$0x1] %v12_v36 }
0x10da   :  { %v1104_v38 = vadd.f32 %v1412_v34, %v1103_v37  ;;  %v1293_v37 = vld [vmem:[%s1964_s4] ss:$0 sm:$0xff] }
0x10dc   :  { %v1108_v41 = vsel %vm1107_vm11, %v1412_v34, %v1104_v38  ;;  %v1197_v34 = vld [vmem:[%s1966_s5 + $0x8] sm:$0xff] }
0x10dd   :  { %v1113_v45 = vsel %vm1110_vm13, %v1112_v42, %v1108_v41  ;;  %v1416_v52 = vpop.eup %1415  ;;  %1225 = vmatpush.msra.mxu1 %v1197_v34 }
0x10de   :  { %v1076_v53 = vmul.f32 %v1416_v52, %v1074_v51  ;;  %vm1081_vm14 = vweird.f32 %v1416_v52 }
0x10df   :  { %vm1082_vm0 = vmor %vm1080_vm15, %vm1081_vm14  ;;  %1226 = vmatpush.msra.mxu1 %v1196_v35 }
0x10e0   :  { %v1077_v54 = vsub.f32 1.0, %v1076_v53  ;;  %v1294_v41 = vld [vmem:[#allocation2] ss:$0 sm:$0xff] }
0x10e2   :  { %v1078_v55 = vmul.f32 %v1416_v52, %v1077_v54 }
0x10e4   :  { %v1079_v56 = vadd.f32 %v1416_v52, %v1078_v55 }
0x10e6   :  { %v1083_v62 = vsel %vm1082_vm0, %v1416_v52, %v1079_v56 }
0x10e7   :  { %v1088_v44 = vsel %vm1085_vm1, %v1087_v40, %v1083_v62 }
0x10e8   :  { %v1116_v19 = vmul.f32 %v1088_v44, %v1869_v20  ;;  %v1164_v20 = vld [vmem:[%s1965_s3 + $0x30] sm:$0xff] }
0x10e9   :  { %1184 = vmatpush.msra.mxu0 %v1164_v20 }
0x1139   :  { %v1119_v43 = vpop.permute.xlu1 %1118 }
0x113a   :  { %v1121_v46 = vmul.f32 %v1119_v43, %v1113_v45 }
0x113c   :  { %1123 = vrot.lane.b32.xlu2 %v1121_v46, %s1423_s28 }
0x1196   :  { %v1124_v57 = vpop.permute.xlu2 %1123 }
0x1197   :  { %v1126_v7 = vadd.f32 %v1124_v57, %v1116_v19 }
0x1199   :  { %v1127_v60 = vmul.f32 %v1126_v7, %v1651_v61  ;;  %1417 = vtanh.f32 %v1126_v7  ;;  %v1163_v61 = vld [vmem:[%s1965_s3 + $0x28] sm:$0xff] }
0x119a   :  { %1185 = vmatpush.msra.mxu0 %v1163_v61 }
0x119b   :  { %1129 = vrot.lane.b32.xlu0 %v1127_v60, %s1423_s28 }
0x119c   :  { %1186 = vmatpush.msra.mxu0 %v1162_v26 }
0x119e   :  { %1187 = vmatpush.msra.mxu0 %v1161_v27 }
0x119f   :  { %v1418_v21 = vpop.eup %1417 }
0x11a0   :  { %1154 = vrot.lane.b32.xlu1 %v1418_v21, %s1423_s28  ;;  %1188 = vmatpush.msra.mxu0 %v1160_v28 }
0x11a2   :  { %1189 = vmatpush.msra.mxu0 %v1159_v29 }
0x11a4   :  { %1190 = vmatpush.msra.mxu0 %v1158_v0 }
0x120d   :  { %v1130_v23 = vpop.permute.xlu0 %1129 }
0x120e   :  { %v1132_v13 = vadd.f32 %v1130_v23, %v1886_v11 }
0x1210   :  { %v1288_v25 = vmul.f32 -1.442695, %v1132_v13 }
0x1212   :  { %1419 = vpow2.f32 %v1288_v25  ;;  %v1155_v11 = vpop.permute.xlu1 %1154 }
0x1218   :  { %v1420_v59 = vpop.eup %1419 }
0x1219   :  { %v1136_v30 = vadd.f32 1.0, %v1420_v59 }
0x121b   :  { %1421 = vrcp.f32 %v1136_v30  ;;  %v1148_v3 = vand.u32 2147483648, %v1136_v30  ;;  %v1146_v5 = vand.u32 2147483647, %v1136_v30  ;;  %vm1142_vm3 = vweird.f32 %v1136_v30 }
0x121d   :  { %v1149_v8 = vor.u32 1.1754944e-38, %v1148_v3  ;;  %vm1147_vm5 = vcmp.eq.f32.partialorder %v1146_v5, 8.507059e+37 }
0x1221   :  { %v1422_v1 = vpop.eup %1421 }
0x1222   :  { %v1138_v10 = vmul.f32 %v1422_v1, %v1136_v30  ;;  %vm1143_vm2 = vweird.f32 %v1422_v1 }
0x1223   :  { %vm1144_vm4 = vmor %vm1142_vm3, %vm1143_vm2 }
0x1224   :  { %v1139_v2 = vsub.f32 1.0, %v1138_v10 }
0x1226   :  { %v1140_v4 = vmul.f32 %v1422_v1, %v1139_v2 }
0x1228   :  { %v1141_v6 = vadd.f32 %v1422_v1, %v1140_v4 }
0x122a   :  { %v1145_v9 = vsel %vm1144_vm4, %v1422_v1, %v1141_v6 }
0x122b   :  { %v1150_v12 = vsel %vm1147_vm5, %v1149_v8, %v1145_v9 }
0x122c   :  { %v1157_v14 = vmul.f32 %v1155_v11, %v1150_v12 }
0x122e   :  { %1171 = vrot.lane.b32.xlu2 %v1157_v14, %s1423_s28 }
0x1288   :  { %v1172_v32 = vpop.permute.xlu2 %1171 }
0x1289   :  { %1289 = vmatmul.msk.f32.vlgmr.msra.gmra.mxu0 %vm50_vm12, %v1172_v32 }
0x1306   :  { %v1192_v38 = vpop.f32.mrf.mxu0 }
0x1307   :  { %v1193_v39 = vadd.f32 %v1293_v37, %v1192_v38 }
0x1309   :  { %v1195_v63 = vmax.f32 %v1193_v39, 0.0 }
0x130b   :  { %1290 = vmatmul.msk.f32.vlgmr.msra.gmra.mxu1 %vm50_vm12, %v1195_v63 }
0x1388   :  { %v1228_v42 = vpop.f32.mrf.mxu1 }
0x1389   :  { %v1229_v43 = vadd.f32 %v1294_v41, %v1228_v42 }
0x138b   :  { %1232 = vst.msk [vmem:[%s1968_s7] sm:$0xff] %vm1231_vm6, %v1229_v43 }

</bundles_post_ra>
